<compile_context>
chip_gen: v7x
topology: tpu7x:2x2x1
jax: 0.10.0
libtpu: 0.0.40
codegen_flags: <defaults>
</compile_context>

<pallas_src>
import functools

import jax
import jax.numpy as jnp
from jax.experimental import pallas as pl
from jax.experimental.pallas import tpu as pltpu


def _gru_policy_kernel(xflat_ref, h_ref,
                       wih0_ref, bih0_ref,
                       whh1_ref, bhh1_ref,
                       wfused_ref, bfused_ref,
                       hw_ref, hb_ref,
                       probs_ref, hout_ref,
                       gi0_ref, seq_ref,
                       *, b_last):
    """Fused, layer-skewed 2-layer GRU recurrence + linear head + softmax (all VMEM)."""
    seq, B, H3 = gi0_ref.shape
    H = H3 // 3
    bf16 = jnp.bfloat16

    # Hoist weight loads and bias broadcasts out of the unrolled time loop.
    whh1 = whh1_ref[...]                                        # (H, 3H)  bf16
    wfused = wfused_ref[...]                                    # (H, 6H)  bf16  [Wih1^T | Whh0^T]
    bhh1_b = jnp.broadcast_to(bhh1_ref[...], (B, 3 * H))        # (B, 3H)  f32
    bfused_b = jnp.broadcast_to(bfused_ref[...], (B, 6 * H))    # (B, 6H)  f32   [b_ih1 | b_hh0]

    # Hoisted layer-0 input projection for ALL timesteps (no recurrent dependence),
    # with b_ih0 folded in; written to scratch so per-step reads are aligned.
    gi0_all = jnp.dot(xflat_ref[...].astype(bf16), wih0_ref[...],
                      preferred_element_type=jnp.float32) + bih0_ref[...]
    gi0_ref[...] = gi0_all.reshape(seq, B, 3 * H)

    # Hidden state carried in f32 between steps (only matmul operands are bf16).
    h0 = h_ref[0]                                               # (B, H)
    h1 = h_ref[1]                                               # (B, H)

    # Prime the skew: gh0(0) = h0_init @ Whh0^T + b_hh0 (the gi1 half is discarded).
    gh0 = (jnp.dot(h0.astype(bf16), wfused,
                   preferred_element_type=jnp.float32) + bfused_b)[:, 3 * H:]

    for t in range(seq):                                        # fully unrolled (seq static)
        gi0 = gi0_ref[t]                                        # (B, 3H), bias already folded

        # Layer-1 recurrent projection: depends only on h1_{t-1}, so it is independent
        # of this step's layer-0 gate math and can overlap with it.
        gh1 = jnp.dot(h1.astype(bf16), whh1,
                      preferred_element_type=jnp.float32) + bhh1_b

        # Layer-0 GRU cell (PyTorch gate order [r, z, n]); r/z sigmoids fused on [0:2H].
        rz0 = jax.nn.sigmoid(gi0[:, :2 * H] + gh0[:, :2 * H])
        r0 = rz0[:, :H]
        z0 = rz0[:, H:]
        n0 = jnp.tanh(gi0[:, 2 * H:] + r0 * gh0[:, 2 * H:])
        h0 = (1.0 - z0) * n0 + z0 * h0

        # Fused skewed matmul: [gi1(t) | gh0(t+1)] = h0_t @ [Wih1^T | Whh0^T] + [b_ih1 | b_hh0].
        fused = jnp.dot(h0.astype(bf16), wfused,
                        preferred_element_type=jnp.float32) + bfused_b
        gi1 = fused[:, :3 * H]
        gh0 = fused[:, 3 * H:]

        # Layer-1 GRU cell.
        rz1 = jax.nn.sigmoid(gi1[:, :2 * H] + gh1[:, :2 * H])
        r1 = rz1[:, :H]
        z1 = rz1[:, H:]
        n1 = jnp.tanh(gi1[:, 2 * H:] + r1 * gh1[:, 2 * H:])
        h1 = (1.0 - z1) * n1 + z1 * h1

        # out[:, -1] == layer-2 hidden of the LAST (real) batch row at every timestep.
        seq_ref[t:t + 1, :] = h1[b_last:b_last + 1, :]

    # Linear head + softmax over the action axis (f32 math, approx EUP reciprocal).
    logits = jnp.dot(seq_ref[...].astype(bf16), hw_ref[...],
                     preferred_element_type=jnp.float32) + hb_ref[...]
    m = jnp.max(logits, axis=-1, keepdims=True)
    e = jnp.exp(logits - m)
    probs_ref[...] = e * pl.reciprocal(jnp.sum(e, axis=-1, keepdims=True), approx=True)

    hout_ref[0] = h0
    hout_ref[1] = h1


def prepare_params(params):
    """One-time repack of PyTorch-layout GRU/head weights for the kernel.

    Call ONCE outside the rollout loop: transposes, the [Wih1^T | Whh0^T] fusion,
    bias reshapes/concats and bf16 casts are hoisted here so the per-call jit graph
    only pads the activations and launches the custom call.
    """
    f32, bf16 = jnp.float32, jnp.bfloat16
    H = params["w_hh0"].shape[1]
    A = params["head_w"].shape[0]
    return {
        "wih0T": params["w_ih0"].T.astype(bf16),                              # (S, 3H)
        "bih0": params["b_ih0"].reshape(1, 3 * H).astype(f32),
        "whh1T": params["w_hh1"].T.astype(bf16),                              # (H, 3H)
        "bhh1": params["b_hh1"].reshape(1, 3 * H).astype(f32),
        "wfused": jnp.concatenate([params["w_ih1"].T, params["w_hh0"].T],
                                  axis=1).astype(bf16),                       # (H, 6H)
        "bfused": jnp.concatenate([params["b_ih1"], params["b_hh0"]]
                                  ).reshape(1, 6 * H).astype(f32),            # (1, 6H)
        "headwT": params["head_w"].T.astype(bf16),                            # (H, A)
        "headb": params["head_b"].reshape(1, A).astype(f32),
    }


def policy_forward(state, hidden, packed):
    """state: (seq, batch, state_len)  hidden: (2, batch, H)  ->  (probs, h)."""
    seq, B, S = state.shape
    L, _, H = hidden.shape
    assert L == 2, "kernel hard-codes GRU_layers=2 (module default)"
    A = packed["headwT"].shape[1]
    f32 = jnp.float32

    # Pad batch to a full 8-sublane f32 tile: padded rows run an independent (ignored)
    # GRU on zeros and keep every (B, .) access / matmul M-dim tile-aligned.
    # TODO(synk): if the RL setup runs many environments, batch them into B here (and add
    # a "parallel" env grid axis to occupy the second v7x TensorCore) instead of one call per env.
    Bp = max(8, ((B + 7) // 8) * 8)
    if Bp != B:
        state = jnp.pad(state, ((0, 0), (0, Bp - B), (0, 0)))
        hidden = jnp.pad(hidden, ((0, 0), (0, Bp - B), (0, 0)))
    xflat = state.reshape(seq * Bp, S).astype(f32)
    h_in = hidden.astype(f32)

    args = (xflat, h_in,
            packed["wih0T"], packed["bih0"],
            packed["whh1T"], packed["bhh1"],
            packed["wfused"], packed["bfused"],
            packed["headwT"], packed["headb"])

    # Advisory cost hint so XLA schedules sensibly around this tiny custom call.
    flops = (2 * seq * Bp * S * 3 * H            # hoisted layer-0 input projection
             + (seq + 1) * 2 * Bp * H * 6 * H    # fused [gi1 | gh0_next] matmuls (+ priming)
             + seq * 2 * Bp * H * 3 * H          # layer-1 recurrent projection
             + 2 * seq * H * A)                  # head
    transcendentals = seq * 6 * Bp * H + seq * A
    bytes_accessed = (sum(int(a.size) * a.dtype.itemsize for a in args)
                      + seq * A * 4 + L * Bp * H * 4)

    vmem = pl.BlockSpec(memory_space=pltpu.MemorySpace.VMEM)
    probs, hout = pl.pallas_call(
        functools.partial(_gru_policy_kernel, b_last=B - 1),
        out_shape=(
            jax.ShapeDtypeStruct((seq, A), f32),        # probs
            jax.ShapeDtypeStruct((L, Bp, H), f32),      # final hidden (padded batch)
        ),
        in_specs=[vmem] * len(args),
        out_specs=(vmem, vmem),
        scratch_shapes=[pltpu.VMEM((seq, Bp, 3 * H), f32),   # hoisted layer-0 projections
                        pltpu.VMEM((seq, H), f32)],          # out[:, -1] rows
        input_output_aliases={1: 1},                         # hidden in -> hidden out
        cost_estimate=pl.CostEstimate(flops=flops,
                                      transcendentals=transcendentals,
                                      bytes_accessed=bytes_accessed),
    )(*args)
    return probs, hout[:, :B, :]


def reference_forward(state, hidden, params):
    """Plain-JAX f32 reference of the PyTorch module's forward()."""
    H = params["w_hh0"].shape[1]
    h0, h1 = hidden[0], hidden[1]
    rows = []
    for t in range(state.shape[0]):
        gi = state[t] @ params["w_ih0"].T + params["b_ih0"]
        gh = h0 @ params["w_hh0"].T + params["b_hh0"]
        r = jax.nn.sigmoid(gi[:, :H] + gh[:, :H])
        z = jax.nn.sigmoid(gi[:, H:2 * H] + gh[:, H:2 * H])
        n = jnp.tanh(gi[:, 2 * H:] + r * gh[:, 2 * H:])
        h0 = (1.0 - z) * n + z * h0
        gi = h0 @ params["w_ih1"].T + params["b_ih1"]
        gh = h1 @ params["w_hh1"].T + params["b_hh1"]
        r = jax.nn.sigmoid(gi[:, :H] + gh[:, :H])
        z = jax.nn.sigmoid(gi[:, H:2 * H] + gh[:, H:2 * H])
        n = jnp.tanh(gi[:, 2 * H:] + r * gh[:, 2 * H:])
        h1 = (1.0 - z) * n + z * h1
        rows.append(h1[-1])                                     # out[:, -1] == last batch row
    logits = jnp.stack(rows) @ params["head_w"].T + params["head_b"]
    return jax.nn.softmax(logits, axis=-1), jnp.stack([h0, h1])


def init_params(key, state_len, num_actions, hidden):
    init_w = 0.011
    k = 1.0 / jnp.sqrt(hidden)
    keys = jax.random.split(key, 10)
    u = lambda kk, shape, lim: jax.random.uniform(kk, shape, jnp.float32, -lim, lim)
    return {
        # layer 0
        "w_ih0": u(keys[0], (3 * hidden, state_len), k),
        "w_hh0": u(keys[1], (3 * hidden, hidden), k),
        "b_ih0": u(keys[2], (3 * hidden,), k),
        "b_hh0": u(keys[3], (3 * hidden,), k),
        # layer 1
        "w_ih1": u(keys[4], (3 * hidden, hidden), k),
        "w_hh1": u(keys[5], (3 * hidden, hidden), k),
        "b_ih1": u(keys[6], (3 * hidden,), k),
        "b_hh1": u(keys[7], (3 * hidden,), k),
        # head (uniform(-init_w, init_w) as in the module)
        "head_w": u(keys[8], (num_actions, hidden), init_w),
        "head_b": u(keys[9], (num_actions,), init_w),
    }


if __name__ == "__main__":
    state_len = 32
    num_actions = 12
    num_frames = 4          # == batch dim of the hidden state (init_hidden)
    GRU_hidden = 64
    seq_len = 8

    key = jax.random.PRNGKey(0)
    pkey, skey = jax.random.split(key)
    params = init_params(pkey, state_len, num_actions, GRU_hidden)
    packed = prepare_params(params)   # one-time weight repack, hoisted out of the call path

    state = jax.random.normal(skey, (seq_len, num_frames, state_len), jnp.float32)
    hidden0 = jnp.zeros((2, num_frames, GRU_hidden), jnp.float32)   # init_hidden()

    fwd = jax.jit(policy_forward)
    probs, h = fwd(state, hidden0, packed)
    probs = jax.block_until_ready(probs)
    h = jax.block_until_ready(h)

    assert probs.shape == (seq_len, num_actions)
    assert h.shape == (2, num_frames, GRU_hidden)
    assert bool(jnp.all(jnp.isfinite(probs)))
    assert bool(jnp.allclose(jnp.sum(probs, axis=-1), 1.0, atol=1e-2))

    # Validate against the plain-JAX f32 reference (kernel matmul operands are bf16,
    # softmax uses an approx reciprocal -> loose tolerance).
    ref_probs, ref_h = reference_forward(state, hidden0, params)
    assert bool(jnp.allclose(probs, ref_probs, atol=3e-2))
    assert bool(jnp.allclose(h, ref_h, atol=3e-2))

    # TODO(synk): get_action's host-side numpy re-weighting/sampling is RL glue,
    # not part of forward(), and is intentionally left outside the kernel.
    print("KERNEL_OK")
</pallas_src>

<mosaic_0001>
module attributes {stable_mosaic.version = 11 : i64} {
  func.func @_gru_policy_kernel(%arg0: memref<64x32xf32, #tpu.memory_space<vmem>>, %arg1: memref<2x8x64xf32, #tpu.memory_space<vmem>>, %arg2: memref<32x192xbf16, #tpu.memory_space<vmem>>, %arg3: memref<1x192xf32, #tpu.memory_space<vmem>>, %arg4: memref<64x192xbf16, #tpu.memory_space<vmem>>, %arg5: memref<1x192xf32, #tpu.memory_space<vmem>>, %arg6: memref<64x384xbf16, #tpu.memory_space<vmem>>, %arg7: memref<1x384xf32, #tpu.memory_space<vmem>>, %arg8: memref<64x12xbf16, #tpu.memory_space<vmem>>, %arg9: memref<1x12xf32, #tpu.memory_space<vmem>>, %arg10: memref<8x12xf32, #tpu.memory_space<vmem>>, %arg11: memref<2x8x64xf32, #tpu.memory_space<vmem>>, %arg12: memref<8x8x192xf32, #tpu.memory_space<vmem>>, %arg13: memref<8x64xf32, #tpu.memory_space<vmem>>) attributes {dimension_semantics = [], scalar_prefetch = 0 : i64, scratch_operands = 2 : i64, tpu.core_type = #tpu.core_type<tc>} {
    %c0 = arith.constant 0 : index
    %c0_0 = arith.constant 0 : index
    %0 = vector.load %arg4[%c0, %c0_0] : memref<64x192xbf16, #tpu.memory_space<vmem>>, vector<64x192xbf16>
    %c0_1 = arith.constant 0 : index
    %c0_2 = arith.constant 0 : index
    %1 = vector.load %arg6[%c0_1, %c0_2] : memref<64x384xbf16, #tpu.memory_space<vmem>>, vector<64x384xbf16>
    %c0_3 = arith.constant 0 : index
    %c0_4 = arith.constant 0 : index
    %2 = vector.load %arg5[%c0_3, %c0_4] : memref<1x192xf32, #tpu.memory_space<vmem>>, vector<1x192xf32>
    %3 = vector.shape_cast %2 : vector<1x192xf32> to vector<1x192xf32>
    %4 = vector.broadcast %3 : vector<1x192xf32> to vector<8x192xf32>
    %c0_5 = arith.constant 0 : index
    %c0_6 = arith.constant 0 : index
    %5 = vector.load %arg7[%c0_5, %c0_6] : memref<1x384xf32, #tpu.memory_space<vmem>>, vector<1x384xf32>
    %6 = vector.shape_cast %5 : vector<1x384xf32> to vector<1x384xf32>
    %7 = vector.broadcast %6 : vector<1x384xf32> to vector<8x384xf32>
    %c0_7 = arith.constant 0 : index
    %c0_8 = arith.constant 0 : index
    %8 = vector.load %arg0[%c0_7, %c0_8] : memref<64x32xf32, #tpu.memory_space<vmem>>, vector<64x32xf32>
    %9 = arith.truncf %8 : vector<64x32xf32> to vector<64x32xbf16>
    %c0_9 = arith.constant 0 : index
    %c0_10 = arith.constant 0 : index
    %10 = vector.load %arg2[%c0_9, %c0_10] : memref<32x192xbf16, #tpu.memory_space<vmem>>, vector<32x192xbf16>
    %cst = arith.constant dense<0.000000e+00> : vector<64x192xf32>
    %11 = tpu.matmul %9, %10, %cst {dimension_numbers = #tpu.dot_dimension_numbers<[1], [0], [0], [1], [0, 0, 1, 1], [], []>} : vector<64x32xbf16>, vector<32x192xbf16>, vector<64x192xf32> -> vector<64x192xf32>
    %c0_11 = arith.constant 0 : index
    %c0_12 = arith.constant 0 : index
    %12 = vector.load %arg3[%c0_11, %c0_12] : memref<1x192xf32, #tpu.memory_space<vmem>>, vector<1x192xf32>
    %13 = vector.broadcast %12 : vector<1x192xf32> to vector<64x192xf32>
    %14 = arith.addf %11, %13 : vector<64x192xf32>
    %15 = vector.shape_cast %14 : vector<64x192xf32> to vector<8x8x192xf32>
    %c0_13 = arith.constant 0 : index
    %c0_14 = arith.constant 0 : index
    %c0_15 = arith.constant 0 : index
    %16 = vector.load %arg12[%c0_13, %c0_14, %c0_15] : memref<8x8x192xf32, #tpu.memory_space<vmem>>, vector<8x8x192xf32>
    tpu.vector_store %arg12[%c0_13, %c0_14, %c0_15], %15 {strides = array<i32>} : memref<8x8x192xf32, #tpu.memory_space<vmem>>, vector<8x8x192xf32>,
    %c0_16 = arith.constant 0 : index
    %c0_17 = arith.constant 0 : index
    %c0_18 = arith.constant 0 : index
    %17 = vector.load %arg1[%c0_16, %c0_17, %c0_18] : memref<2x8x64xf32, #tpu.memory_space<vmem>>, vector<1x8x64xf32>
    %18 = vector.shape_cast %17 : vector<1x8x64xf32> to vector<8x64xf32>
    %c1 = arith.constant 1 : index
    %c0_19 = arith.constant 0 : index
    %c0_20 = arith.constant 0 : index
    %19 = vector.load %arg1[%c1, %c0_19, %c0_20] : memref<2x8x64xf32, #tpu.memory_space<vmem>>, vector<1x8x64xf32>
    %20 = vector.shape_cast %19 : vector<1x8x64xf32> to vector<8x64xf32>
    %21 = arith.truncf %18 : vector<8x64xf32> to vector<8x64xbf16>
    %cst_21 = arith.constant dense<0.000000e+00> : vector<8x384xf32>
    %22 = tpu.matmul %21, %1, %cst_21 {dimension_numbers = #tpu.dot_dimension_numbers<[1], [0], [0], [1], [0, 0, 1, 1], [], []>} : vector<8x64xbf16>, vector<64x384xbf16>, vector<8x384xf32> -> vector<8x384xf32>
    %23 = arith.addf %22, %7 : vector<8x384xf32>
    %24 = vector.extract_strided_slice %23 {offsets = [0, 192], sizes = [8, 192], strides = [1, 1]} : vector<8x384xf32> to vector<8x192xf32>
    %c0_22 = arith.constant 0 : index
    %c0_23 = arith.constant 0 : index
    %c0_24 = arith.constant 0 : index
    %25 = vector.load %arg12[%c0_22, %c0_23, %c0_24] : memref<8x8x192xf32, #tpu.memory_space<vmem>>, vector<1x8x192xf32>
    %26 = vector.shape_cast %25 : vector<1x8x192xf32> to vector<8x192xf32>
    %27 = arith.truncf %20 : vector<8x64xf32> to vector<8x64xbf16>
    %cst_25 = arith.constant dense<0.000000e+00> : vector<8x192xf32>
    %28 = tpu.matmul %27, %0, %cst_25 {dimension_numbers = #tpu.dot_dimension_numbers<[1], [0], [0], [1], [0, 0, 1, 1], [], []>} : vector<8x64xbf16>, vector<64x192xbf16>, vector<8x192xf32> -> vector<8x192xf32>
    %29 = arith.addf %28, %4 : vector<8x192xf32>
    %30 = vector.extract_strided_slice %26 {offsets = [0, 0], sizes = [8, 128], strides = [1, 1]} : vector<8x192xf32> to vector<8x128xf32>
    %31 = vector.extract_strided_slice %24 {offsets = [0, 0], sizes = [8, 128], strides = [1, 1]} : vector<8x192xf32> to vector<8x128xf32>
    %32 = arith.addf %30, %31 : vector<8x128xf32>
    %33 = arith.negf %32 : vector<8x128xf32>
    %34 = math.exp %33 : vector<8x128xf32>
    %cst_26 = arith.constant 1.000000e+00 : f32
    %35 = vector.broadcast %cst_26 : f32 to vector<8x128xf32>
    %36 = arith.addf %35, %34 : vector<8x128xf32>
    %37 = arith.divf %35, %36 : vector<8x128xf32>
    %38 = vector.extract_strided_slice %37 {offsets = [0, 0], sizes = [8, 64], strides = [1, 1]} : vector<8x128xf32> to vector<8x64xf32>
    %39 = vector.extract_strided_slice %37 {offsets = [0, 64], sizes = [8, 64], strides = [1, 1]} : vector<8x128xf32> to vector<8x64xf32>
    %40 = vector.extract_strided_slice %26 {offsets = [0, 128], sizes = [8, 64], strides = [1, 1]} : vector<8x192xf32> to vector<8x64xf32>
    %41 = vector.extract_strided_slice %24 {offsets = [0, 128], sizes = [8, 64], strides = [1, 1]} : vector<8x192xf32> to vector<8x64xf32>
    %42 = arith.mulf %38, %41 : vector<8x64xf32>
    %43 = arith.addf %40, %42 : vector<8x64xf32>
    %44 = math.tanh %43 : vector<8x64xf32>
    %cst_27 = arith.constant 1.000000e+00 : f32
    %45 = vector.broadcast %cst_27 : f32 to vector<8x64xf32>
    %46 = arith.subf %45, %39 : vector<8x64xf32>
    %47 = arith.mulf %46, %44 : vector<8x64xf32>
    %48 = arith.mulf %39, %18 : vector<8x64xf32>
    %49 = arith.addf %47, %48 : vector<8x64xf32>
    %50 = arith.truncf %49 : vector<8x64xf32> to vector<8x64xbf16>
    %cst_28 = arith.constant dense<0.000000e+00> : vector<8x384xf32>
    %51 = tpu.matmul %50, %1, %cst_28 {dimension_numbers = #tpu.dot_dimension_numbers<[1], [0], [0], [1], [0, 0, 1, 1], [], []>} : vector<8x64xbf16>, vector<64x384xbf16>, vector<8x384xf32> -> vector<8x384xf32>
    %52 = arith.addf %51, %7 : vector<8x384xf32>
    %53 = vector.extract_strided_slice %52 {offsets = [0, 0], sizes = [8, 192], strides = [1, 1]} : vector<8x384xf32> to vector<8x192xf32>
    %54 = vector.extract_strided_slice %52 {offsets = [0, 192], sizes = [8, 192], strides = [1, 1]} : vector<8x384xf32> to vector<8x192xf32>
    %55 = vector.extract_strided_slice %53 {offsets = [0, 0], sizes = [8, 128], strides = [1, 1]} : vector<8x192xf32> to vector<8x128xf32>
    %56 = vector.extract_strided_slice %29 {offsets = [0, 0], sizes = [8, 128], strides = [1, 1]} : vector<8x192xf32> to vector<8x128xf32>
    %57 = arith.addf %55, %56 : vector<8x128xf32>
    %58 = arith.negf %57 : vector<8x128xf32>
    %59 = math.exp %58 : vector<8x128xf32>
    %cst_29 = arith.constant 1.000000e+00 : f32
    %60 = vector.broadcast %cst_29 : f32 to vector<8x128xf32>
    %61 = arith.addf %60, %59 : vector<8x128xf32>
    %62 = arith.divf %60, %61 : vector<8x128xf32>
    %63 = vector.extract_strided_slice %62 {offsets = [0, 0], sizes = [8, 64], strides = [1, 1]} : vector<8x128xf32> to vector<8x64xf32>
    %64 = vector.extract_strided_slice %62 {offsets = [0, 64], sizes = [8, 64], strides = [1, 1]} : vector<8x128xf32> to vector<8x64xf32>
    %65 = vector.extract_strided_slice %53 {offsets = [0, 128], sizes = [8, 64], strides = [1, 1]} : vector<8x192xf32> to vector<8x64xf32>
    %66 = vector.extract_strided_slice %29 {offsets = [0, 128], sizes = [8, 64], strides = [1, 1]} : vector<8x192xf32> to vector<8x64xf32>
    %67 = arith.mulf %63, %66 : vector<8x64xf32>
    %68 = arith.addf %65, %67 : vector<8x64xf32>
    %69 = math.tanh %68 : vector<8x64xf32>
    %cst_30 = arith.constant 1.000000e+00 : f32
    %70 = vector.broadcast %cst_30 : f32 to vector<8x64xf32>
    %71 = arith.subf %70, %64 : vector<8x64xf32>
    %72 = arith.mulf %71, %69 : vector<8x64xf32>
    %73 = arith.mulf %64, %20 : vector<8x64xf32>
    %74 = arith.addf %72, %73 : vector<8x64xf32>
    %75 = vector.extract_strided_slice %74 {offsets = [3, 0], sizes = [1, 64], strides = [1, 1]} : vector<8x64xf32> to vector<1x64xf32>
    %c0_31 = arith.constant 0 : index
    %c0_32 = arith.constant 0 : index
    %76 = vector.load %arg13[%c0_31, %c0_32] : memref<8x64xf32, #tpu.memory_space<vmem>>, vector<1x64xf32>
    tpu.vector_store %arg13[%c0_31, %c0_32], %75 {strides = array<i32>} : memref<8x64xf32, #tpu.memory_space<vmem>>, vector<1x64xf32>,
    %c1_33 = arith.constant 1 : index
    %c0_34 = arith.constant 0 : index
    %c0_35 = arith.constant 0 : index
    %77 = vector.load %arg12[%c1_33, %c0_34, %c0_35] : memref<8x8x192xf32, #tpu.memory_space<vmem>>, vector<1x8x192xf32>
    %78 = vector.shape_cast %77 : vector<1x8x192xf32> to vector<8x192xf32>
    %79 = arith.truncf %74 : vector<8x64xf32> to vector<8x64xbf16>
    %cst_36 = arith.constant dense<0.000000e+00> : vector<8x192xf32>
    %80 = tpu.matmul %79, %0, %cst_36 {dimension_numbers = #tpu.dot_dimension_numbers<[1], [0], [0], [1], [0, 0, 1, 1], [], []>} : vector<8x64xbf16>, vector<64x192xbf16>, vector<8x192xf32> -> vector<8x192xf32>
    %81 = arith.addf %80, %4 : vector<8x192xf32>
    %82 = vector.extract_strided_slice %78 {offsets = [0, 0], sizes = [8, 128], strides = [1, 1]} : vector<8x192xf32> to vector<8x128xf32>
    %83 = vector.extract_strided_slice %54 {offsets = [0, 0], sizes = [8, 128], strides = [1, 1]} : vector<8x192xf32> to vector<8x128xf32>
    %84 = arith.addf %82, %83 : vector<8x128xf32>
    %85 = arith.negf %84 : vector<8x128xf32>
    %86 = math.exp %85 : vector<8x128xf32>
    %cst_37 = arith.constant 1.000000e+00 : f32
    %87 = vector.broadcast %cst_37 : f32 to vector<8x128xf32>
    %88 = arith.addf %87, %86 : vector<8x128xf32>
    %89 = arith.divf %87, %88 : vector<8x128xf32>
    %90 = vector.extract_strided_slice %89 {offsets = [0, 0], sizes = [8, 64], strides = [1, 1]} : vector<8x128xf32> to vector<8x64xf32>
    %91 = vector.extract_strided_slice %89 {offsets = [0, 64], sizes = [8, 64], strides = [1, 1]} : vector<8x128xf32> to vector<8x64xf32>
    %92 = vector.extract_strided_slice %78 {offsets = [0, 128], sizes = [8, 64], strides = [1, 1]} : vector<8x192xf32> to vector<8x64xf32>
    %93 = vector.extract_strided_slice %54 {offsets = [0, 128], sizes = [8, 64], strides = [1, 1]} : vector<8x192xf32> to vector<8x64xf32>
    %94 = arith.mulf %90, %93 : vector<8x64xf32>
    %95 = arith.addf %92, %94 : vector<8x64xf32>
    %96 = math.tanh %95 : vector<8x64xf32>
    %cst_38 = arith.constant 1.000000e+00 : f32
    %97 = vector.broadcast %cst_38 : f32 to vector<8x64xf32>
    %98 = arith.subf %97, %91 : vector<8x64xf32>
    %99 = arith.mulf %98, %96 : vector<8x64xf32>
    %100 = arith.mulf %91, %49 : vector<8x64xf32>
    %101 = arith.addf %99, %100 : vector<8x64xf32>
    %102 = arith.truncf %101 : vector<8x64xf32> to vector<8x64xbf16>
    %cst_39 = arith.constant dense<0.000000e+00> : vector<8x384xf32>
    %103 = tpu.matmul %102, %1, %cst_39 {dimension_numbers = #tpu.dot_dimension_numbers<[1], [0], [0], [1], [0, 0, 1, 1], [], []>} : vector<8x64xbf16>, vector<64x384xbf16>, vector<8x384xf32> -> vector<8x384xf32>
    %104 = arith.addf %103, %7 : vector<8x384xf32>
    %105 = vector.extract_strided_slice %104 {offsets = [0, 0], sizes = [8, 192], strides = [1, 1]} : vector<8x384xf32> to vector<8x192xf32>
    %106 = vector.extract_strided_slice %104 {offsets = [0, 192], sizes = [8, 192], strides = [1, 1]} : vector<8x384xf32> to vector<8x192xf32>
    %107 = vector.extract_strided_slice %105 {offsets = [0, 0], sizes = [8, 128], strides = [1, 1]} : vector<8x192xf32> to vector<8x128xf32>
    %108 = vector.extract_strided_slice %81 {offsets = [0, 0], sizes = [8, 128], strides = [1, 1]} : vector<8x192xf32> to vector<8x128xf32>
    %109 = arith.addf %107, %108 : vector<8x128xf32>
    %110 = arith.negf %109 : vector<8x128xf32>
    %111 = math.exp %110 : vector<8x128xf32>
    %cst_40 = arith.constant 1.000000e+00 : f32
    %112 = vector.broadcast %cst_40 : f32 to vector<8x128xf32>
    %113 = arith.addf %112, %111 : vector<8x128xf32>
    %114 = arith.divf %112, %113 : vector<8x128xf32>
    %115 = vector.extract_strided_slice %114 {offsets = [0, 0], sizes = [8, 64], strides = [1, 1]} : vector<8x128xf32> to vector<8x64xf32>
    %116 = vector.extract_strided_slice %114 {offsets = [0, 64], sizes = [8, 64], strides = [1, 1]} : vector<8x128xf32> to vector<8x64xf32>
    %117 = vector.extract_strided_slice %105 {offsets = [0, 128], sizes = [8, 64], strides = [1, 1]} : vector<8x192xf32> to vector<8x64xf32>
    %118 = vector.extract_strided_slice %81 {offsets = [0, 128], sizes = [8, 64], strides = [1, 1]} : vector<8x192xf32> to vector<8x64xf32>
    %119 = arith.mulf %115, %118 : vector<8x64xf32>
    %120 = arith.addf %117, %119 : vector<8x64xf32>
    %121 = math.tanh %120 : vector<8x64xf32>
    %cst_41 = arith.constant 1.000000e+00 : f32
    %122 = vector.broadcast %cst_41 : f32 to vector<8x64xf32>
    %123 = arith.subf %122, %116 : vector<8x64xf32>
    %124 = arith.mulf %123, %121 : vector<8x64xf32>
    %125 = arith.mulf %116, %74 : vector<8x64xf32>
    %126 = arith.addf %124, %125 : vector<8x64xf32>
    %127 = vector.extract_strided_slice %126 {offsets = [3, 0], sizes = [1, 64], strides = [1, 1]} : vector<8x64xf32> to vector<1x64xf32>
    %c1_42 = arith.constant 1 : index
    %c0_43 = arith.constant 0 : index
    %128 = vector.load %arg13[%c1_42, %c0_43] : memref<8x64xf32, #tpu.memory_space<vmem>>, vector<1x64xf32>
    tpu.vector_store %arg13[%c1_42, %c0_43], %127 {strides = array<i32>} : memref<8x64xf32, #tpu.memory_space<vmem>>, vector<1x64xf32>,
    %c2 = arith.constant 2 : index
    %c0_44 = arith.constant 0 : index
    %c0_45 = arith.constant 0 : index
    %129 = vector.load %arg12[%c2, %c0_44, %c0_45] : memref<8x8x192xf32, #tpu.memory_space<vmem>>, vector<1x8x192xf32>
    %130 = vector.shape_cast %129 : vector<1x8x192xf32> to vector<8x192xf32>
    %131 = arith.truncf %126 : vector<8x64xf32> to vector<8x64xbf16>
    %cst_46 = arith.constant dense<0.000000e+00> : vector<8x192xf32>
    %132 = tpu.matmul %131, %0, %cst_46 {dimension_numbers = #tpu.dot_dimension_numbers<[1], [0], [0], [1], [0, 0, 1, 1], [], []>} : vector<8x64xbf16>, vector<64x192xbf16>, vector<8x192xf32> -> vector<8x192xf32>
    %133 = arith.addf %132, %4 : vector<8x192xf32>
    %134 = vector.extract_strided_slice %130 {offsets = [0, 0], sizes = [8, 128], strides = [1, 1]} : vector<8x192xf32> to vector<8x128xf32>
    %135 = vector.extract_strided_slice %106 {offsets = [0, 0], sizes = [8, 128], strides = [1, 1]} : vector<8x192xf32> to vector<8x128xf32>
    %136 = arith.addf %134, %135 : vector<8x128xf32>
    %137 = arith.negf %136 : vector<8x128xf32>
    %138 = math.exp %137 : vector<8x128xf32>
    %cst_47 = arith.constant 1.000000e+00 : f32
    %139 = vector.broadcast %cst_47 : f32 to vector<8x128xf32>
    %140 = arith.addf %139, %138 : vector<8x128xf32>
    %141 = arith.divf %139, %140 : vector<8x128xf32>
    %142 = vector.extract_strided_slice %141 {offsets = [0, 0], sizes = [8, 64], strides = [1, 1]} : vector<8x128xf32> to vector<8x64xf32>
    %143 = vector.extract_strided_slice %141 {offsets = [0, 64], sizes = [8, 64], strides = [1, 1]} : vector<8x128xf32> to vector<8x64xf32>
    %144 = vector.extract_strided_slice %130 {offsets = [0, 128], sizes = [8, 64], strides = [1, 1]} : vector<8x192xf32> to vector<8x64xf32>
    %145 = vector.extract_strided_slice %106 {offsets = [0, 128], sizes = [8, 64], strides = [1, 1]} : vector<8x192xf32> to vector<8x64xf32>
    %146 = arith.mulf %142, %145 : vector<8x64xf32>
    %147 = arith.addf %144, %146 : vector<8x64xf32>
    %148 = math.tanh %147 : vector<8x64xf32>
    %cst_48 = arith.constant 1.000000e+00 : f32
    %149 = vector.broadcast %cst_48 : f32 to vector<8x64xf32>
    %150 = arith.subf %149, %143 : vector<8x64xf32>
    %151 = arith.mulf %150, %148 : vector<8x64xf32>
    %152 = arith.mulf %143, %101 : vector<8x64xf32>
    %153 = arith.addf %151, %152 : vector<8x64xf32>
    %154 = arith.truncf %153 : vector<8x64xf32> to vector<8x64xbf16>
    %cst_49 = arith.constant dense<0.000000e+00> : vector<8x384xf32>
    %155 = tpu.matmul %154, %1, %cst_49 {dimension_numbers = #tpu.dot_dimension_numbers<[1], [0], [0], [1], [0, 0, 1, 1], [], []>} : vector<8x64xbf16>, vector<64x384xbf16>, vector<8x384xf32> -> vector<8x384xf32>
    %156 = arith.addf %155, %7 : vector<8x384xf32>
    %157 = vector.extract_strided_slice %156 {offsets = [0, 0], sizes = [8, 192], strides = [1, 1]} : vector<8x384xf32> to vector<8x192xf32>
    %158 = vector.extract_strided_slice %156 {offsets = [0, 192], sizes = [8, 192], strides = [1, 1]} : vector<8x384xf32> to vector<8x192xf32>
    %159 = vector.extract_strided_slice %157 {offsets = [0, 0], sizes = [8, 128], strides = [1, 1]} : vector<8x192xf32> to vector<8x128xf32>
    %160 = vector.extract_strided_slice %133 {offsets = [0, 0], sizes = [8, 128], strides = [1, 1]} : vector<8x192xf32> to vector<8x128xf32>
    %161 = arith.addf %159, %160 : vector<8x128xf32>
    %162 = arith.negf %161 : vector<8x128xf32>
    %163 = math.exp %162 : vector<8x128xf32>
    %cst_50 = arith.constant 1.000000e+00 : f32
    %164 = vector.broadcast %cst_50 : f32 to vector<8x128xf32>
    %165 = arith.addf %164, %163 : vector<8x128xf32>
    %166 = arith.divf %164, %165 : vector<8x128xf32>
    %167 = vector.extract_strided_slice %166 {offsets = [0, 0], sizes = [8, 64], strides = [1, 1]} : vector<8x128xf32> to vector<8x64xf32>
    %168 = vector.extract_strided_slice %166 {offsets = [0, 64], sizes = [8, 64], strides = [1, 1]} : vector<8x128xf32> to vector<8x64xf32>
    %169 = vector.extract_strided_slice %157 {offsets = [0, 128], sizes = [8, 64], strides = [1, 1]} : vector<8x192xf32> to vector<8x64xf32>
    %170 = vector.extract_strided_slice %133 {offsets = [0, 128], sizes = [8, 64], strides = [1, 1]} : vector<8x192xf32> to vector<8x64xf32>
    %171 = arith.mulf %167, %170 : vector<8x64xf32>
    %172 = arith.addf %169, %171 : vector<8x64xf32>
    %173 = math.tanh %172 : vector<8x64xf32>
    %cst_51 = arith.constant 1.000000e+00 : f32
    %174 = vector.broadcast %cst_51 : f32 to vector<8x64xf32>
    %175 = arith.subf %174, %168 : vector<8x64xf32>
    %176 = arith.mulf %175, %173 : vector<8x64xf32>
    %177 = arith.mulf %168, %126 : vector<8x64xf32>
    %178 = arith.addf %176, %177 : vector<8x64xf32>
    %179 = vector.extract_strided_slice %178 {offsets = [3, 0], sizes = [1, 64], strides = [1, 1]} : vector<8x64xf32> to vector<1x64xf32>
    %c2_52 = arith.constant 2 : index
    %c0_53 = arith.constant 0 : index
    %180 = vector.load %arg13[%c2_52, %c0_53] : memref<8x64xf32, #tpu.memory_space<vmem>>, vector<1x64xf32>
    tpu.vector_store %arg13[%c2_52, %c0_53], %179 {strides = array<i32>} : memref<8x64xf32, #tpu.memory_space<vmem>>, vector<1x64xf32>,
    %c3 = arith.constant 3 : index
    %c0_54 = arith.constant 0 : index
    %c0_55 = arith.constant 0 : index
    %181 = vector.load %arg12[%c3, %c0_54, %c0_55] : memref<8x8x192xf32, #tpu.memory_space<vmem>>, vector<1x8x192xf32>
    %182 = vector.shape_cast %181 : vector<1x8x192xf32> to vector<8x192xf32>
    %183 = arith.truncf %178 : vector<8x64xf32> to vector<8x64xbf16>
    %cst_56 = arith.constant dense<0.000000e+00> : vector<8x192xf32>
    %184 = tpu.matmul %183, %0, %cst_56 {dimension_numbers = #tpu.dot_dimension_numbers<[1], [0], [0], [1], [0, 0, 1, 1], [], []>} : vector<8x64xbf16>, vector<64x192xbf16>, vector<8x192xf32> -> vector<8x192xf32>
    %185 = arith.addf %184, %4 : vector<8x192xf32>
    %186 = vector.extract_strided_slice %182 {offsets = [0, 0], sizes = [8, 128], strides = [1, 1]} : vector<8x192xf32> to vector<8x128xf32>
    %187 = vector.extract_strided_slice %158 {offsets = [0, 0], sizes = [8, 128], strides = [1, 1]} : vector<8x192xf32> to vector<8x128xf32>
    %188 = arith.addf %186, %187 : vector<8x128xf32>
    %189 = arith.negf %188 : vector<8x128xf32>
    %190 = math.exp %189 : vector<8x128xf32>
    %cst_57 = arith.constant 1.000000e+00 : f32
    %191 = vector.broadcast %cst_57 : f32 to vector<8x128xf32>
    %192 = arith.addf %191, %190 : vector<8x128xf32>
    %193 = arith.divf %191, %192 : vector<8x128xf32>
    %194 = vector.extract_strided_slice %193 {offsets = [0, 0], sizes = [8, 64], strides = [1, 1]} : vector<8x128xf32> to vector<8x64xf32>
    %195 = vector.extract_strided_slice %193 {offsets = [0, 64], sizes = [8, 64], strides = [1, 1]} : vector<8x128xf32> to vector<8x64xf32>
    %196 = vector.extract_strided_slice %182 {offsets = [0, 128], sizes = [8, 64], strides = [1, 1]} : vector<8x192xf32> to vector<8x64xf32>
    %197 = vector.extract_strided_slice %158 {offsets = [0, 128], sizes = [8, 64], strides = [1, 1]} : vector<8x192xf32> to vector<8x64xf32>
    %198 = arith.mulf %194, %197 : vector<8x64xf32>
    %199 = arith.addf %196, %198 : vector<8x64xf32>
    %200 = math.tanh %199 : vector<8x64xf32>
    %cst_58 = arith.constant 1.000000e+00 : f32
    %201 = vector.broadcast %cst_58 : f32 to vector<8x64xf32>
    %202 = arith.subf %201, %195 : vector<8x64xf32>
    %203 = arith.mulf %202, %200 : vector<8x64xf32>
    %204 = arith.mulf %195, %153 : vector<8x64xf32>
    %205 = arith.addf %203, %204 : vector<8x64xf32>
    %206 = arith.truncf %205 : vector<8x64xf32> to vector<8x64xbf16>
    %cst_59 = arith.constant dense<0.000000e+00> : vector<8x384xf32>
    %207 = tpu.matmul %206, %1, %cst_59 {dimension_numbers = #tpu.dot_dimension_numbers<[1], [0], [0], [1], [0, 0, 1, 1], [], []>} : vector<8x64xbf16>, vector<64x384xbf16>, vector<8x384xf32> -> vector<8x384xf32>
    %208 = arith.addf %207, %7 : vector<8x384xf32>
    %209 = vector.extract_strided_slice %208 {offsets = [0, 0], sizes = [8, 192], strides = [1, 1]} : vector<8x384xf32> to vector<8x192xf32>
    %210 = vector.extract_strided_slice %208 {offsets = [0, 192], sizes = [8, 192], strides = [1, 1]} : vector<8x384xf32> to vector<8x192xf32>
    %211 = vector.extract_strided_slice %209 {offsets = [0, 0], sizes = [8, 128], strides = [1, 1]} : vector<8x192xf32> to vector<8x128xf32>
    %212 = vector.extract_strided_slice %185 {offsets = [0, 0], sizes = [8, 128], strides = [1, 1]} : vector<8x192xf32> to vector<8x128xf32>
    %213 = arith.addf %211, %212 : vector<8x128xf32>
    %214 = arith.negf %213 : vector<8x128xf32>
    %215 = math.exp %214 : vector<8x128xf32>
    %cst_60 = arith.constant 1.000000e+00 : f32
    %216 = vector.broadcast %cst_60 : f32 to vector<8x128xf32>
    %217 = arith.addf %216, %215 : vector<8x128xf32>
    %218 = arith.divf %216, %217 : vector<8x128xf32>
    %219 = vector.extract_strided_slice %218 {offsets = [0, 0], sizes = [8, 64], strides = [1, 1]} : vector<8x128xf32> to vector<8x64xf32>
    %220 = vector.extract_strided_slice %218 {offsets = [0, 64], sizes = [8, 64], strides = [1, 1]} : vector<8x128xf32> to vector<8x64xf32>
    %221 = vector.extract_strided_slice %209 {offsets = [0, 128], sizes = [8, 64], strides = [1, 1]} : vector<8x192xf32> to vector<8x64xf32>
    %222 = vector.extract_strided_slice %185 {offsets = [0, 128], sizes = [8, 64], strides = [1, 1]} : vector<8x192xf32> to vector<8x64xf32>
    %223 = arith.mulf %219, %222 : vector<8x64xf32>
    %224 = arith.addf %221, %223 : vector<8x64xf32>
    %225 = math.tanh %224 : vector<8x64xf32>
    %cst_61 = arith.constant 1.000000e+00 : f32
    %226 = vector.broadcast %cst_61 : f32 to vector<8x64xf32>
    %227 = arith.subf %226, %220 : vector<8x64xf32>
    %228 = arith.mulf %227, %225 : vector<8x64xf32>
    %229 = arith.mulf %220, %178 : vector<8x64xf32>
    %230 = arith.addf %228, %229 : vector<8x64xf32>
    %231 = vector.extract_strided_slice %230 {offsets = [3, 0], sizes = [1, 64], strides = [1, 1]} : vector<8x64xf32> to vector<1x64xf32>
    %c3_62 = arith.constant 3 : index
    %c0_63 = arith.constant 0 : index
    %232 = vector.load %arg13[%c3_62, %c0_63] : memref<8x64xf32, #tpu.memory_space<vmem>>, vector<1x64xf32>
    tpu.vector_store %arg13[%c3_62, %c0_63], %231 {strides = array<i32>} : memref<8x64xf32, #tpu.memory_space<vmem>>, vector<1x64xf32>,
    %c4 = arith.constant 4 : index
    %c0_64 = arith.constant 0 : index
    %c0_65 = arith.constant 0 : index
    %233 = vector.load %arg12[%c4, %c0_64, %c0_65] : memref<8x8x192xf32, #tpu.memory_space<vmem>>, vector<1x8x192xf32>
    %234 = vector.shape_cast %233 : vector<1x8x192xf32> to vector<8x192xf32>
    %235 = arith.truncf %230 : vector<8x64xf32> to vector<8x64xbf16>
    %cst_66 = arith.constant dense<0.000000e+00> : vector<8x192xf32>
    %236 = tpu.matmul %235, %0, %cst_66 {dimension_numbers = #tpu.dot_dimension_numbers<[1], [0], [0], [1], [0, 0, 1, 1], [], []>} : vector<8x64xbf16>, vector<64x192xbf16>, vector<8x192xf32> -> vector<8x192xf32>
    %237 = arith.addf %236, %4 : vector<8x192xf32>
    %238 = vector.extract_strided_slice %234 {offsets = [0, 0], sizes = [8, 128], strides = [1, 1]} : vector<8x192xf32> to vector<8x128xf32>
    %239 = vector.extract_strided_slice %210 {offsets = [0, 0], sizes = [8, 128], strides = [1, 1]} : vector<8x192xf32> to vector<8x128xf32>
    %240 = arith.addf %238, %239 : vector<8x128xf32>
    %241 = arith.negf %240 : vector<8x128xf32>
    %242 = math.exp %241 : vector<8x128xf32>
    %cst_67 = arith.constant 1.000000e+00 : f32
    %243 = vector.broadcast %cst_67 : f32 to vector<8x128xf32>
    %244 = arith.addf %243, %242 : vector<8x128xf32>
    %245 = arith.divf %243, %244 : vector<8x128xf32>
    %246 = vector.extract_strided_slice %245 {offsets = [0, 0], sizes = [8, 64], strides = [1, 1]} : vector<8x128xf32> to vector<8x64xf32>
    %247 = vector.extract_strided_slice %245 {offsets = [0, 64], sizes = [8, 64], strides = [1, 1]} : vector<8x128xf32> to vector<8x64xf32>
    %248 = vector.extract_strided_slice %234 {offsets = [0, 128], sizes = [8, 64], strides = [1, 1]} : vector<8x192xf32> to vector<8x64xf32>
    %249 = vector.extract_strided_slice %210 {offsets = [0, 128], sizes = [8, 64], strides = [1, 1]} : vector<8x192xf32> to vector<8x64xf32>
    %250 = arith.mulf %246, %249 : vector<8x64xf32>
    %251 = arith.addf %248, %250 : vector<8x64xf32>
    %252 = math.tanh %251 : vector<8x64xf32>
    %cst_68 = arith.constant 1.000000e+00 : f32
    %253 = vector.broadcast %cst_68 : f32 to vector<8x64xf32>
    %254 = arith.subf %253, %247 : vector<8x64xf32>
    %255 = arith.mulf %254, %252 : vector<8x64xf32>
    %256 = arith.mulf %247, %205 : vector<8x64xf32>
    %257 = arith.addf %255, %256 : vector<8x64xf32>
    %258 = arith.truncf %257 : vector<8x64xf32> to vector<8x64xbf16>
    %cst_69 = arith.constant dense<0.000000e+00> : vector<8x384xf32>
    %259 = tpu.matmul %258, %1, %cst_69 {dimension_numbers = #tpu.dot_dimension_numbers<[1], [0], [0], [1], [0, 0, 1, 1], [], []>} : vector<8x64xbf16>, vector<64x384xbf16>, vector<8x384xf32> -> vector<8x384xf32>
    %260 = arith.addf %259, %7 : vector<8x384xf32>
    %261 = vector.extract_strided_slice %260 {offsets = [0, 0], sizes = [8, 192], strides = [1, 1]} : vector<8x384xf32> to vector<8x192xf32>
    %262 = vector.extract_strided_slice %260 {offsets = [0, 192], sizes = [8, 192], strides = [1, 1]} : vector<8x384xf32> to vector<8x192xf32>
    %263 = vector.extract_strided_slice %261 {offsets = [0, 0], sizes = [8, 128], strides = [1, 1]} : vector<8x192xf32> to vector<8x128xf32>
    %264 = vector.extract_strided_slice %237 {offsets = [0, 0], sizes = [8, 128], strides = [1, 1]} : vector<8x192xf32> to vector<8x128xf32>
    %265 = arith.addf %263, %264 : vector<8x128xf32>
    %266 = arith.negf %265 : vector<8x128xf32>
    %267 = math.exp %266 : vector<8x128xf32>
    %cst_70 = arith.constant 1.000000e+00 : f32
    %268 = vector.broadcast %cst_70 : f32 to vector<8x128xf32>
    %269 = arith.addf %268, %267 : vector<8x128xf32>
    %270 = arith.divf %268, %269 : vector<8x128xf32>
    %271 = vector.extract_strided_slice %270 {offsets = [0, 0], sizes = [8, 64], strides = [1, 1]} : vector<8x128xf32> to vector<8x64xf32>
    %272 = vector.extract_strided_slice %270 {offsets = [0, 64], sizes = [8, 64], strides = [1, 1]} : vector<8x128xf32> to vector<8x64xf32>
    %273 = vector.extract_strided_slice %261 {offsets = [0, 128], sizes = [8, 64], strides = [1, 1]} : vector<8x192xf32> to vector<8x64xf32>
    %274 = vector.extract_strided_slice %237 {offsets = [0, 128], sizes = [8, 64], strides = [1, 1]} : vector<8x192xf32> to vector<8x64xf32>
    %275 = arith.mulf %271, %274 : vector<8x64xf32>
    %276 = arith.addf %273, %275 : vector<8x64xf32>
    %277 = math.tanh %276 : vector<8x64xf32>
    %cst_71 = arith.constant 1.000000e+00 : f32
    %278 = vector.broadcast %cst_71 : f32 to vector<8x64xf32>
    %279 = arith.subf %278, %272 : vector<8x64xf32>
    %280 = arith.mulf %279, %277 : vector<8x64xf32>
    %281 = arith.mulf %272, %230 : vector<8x64xf32>
    %282 = arith.addf %280, %281 : vector<8x64xf32>
    %283 = vector.extract_strided_slice %282 {offsets = [3, 0], sizes = [1, 64], strides = [1, 1]} : vector<8x64xf32> to vector<1x64xf32>
    %c4_72 = arith.constant 4 : index
    %c0_73 = arith.constant 0 : index
    %284 = vector.load %arg13[%c4_72, %c0_73] : memref<8x64xf32, #tpu.memory_space<vmem>>, vector<1x64xf32>
    tpu.vector_store %arg13[%c4_72, %c0_73], %283 {strides = array<i32>} : memref<8x64xf32, #tpu.memory_space<vmem>>, vector<1x64xf32>,
    %c5 = arith.constant 5 : index
    %c0_74 = arith.constant 0 : index
    %c0_75 = arith.constant 0 : index
    %285 = vector.load %arg12[%c5, %c0_74, %c0_75] : memref<8x8x192xf32, #tpu.memory_space<vmem>>, vector<1x8x192xf32>
    %286 = vector.shape_cast %285 : vector<1x8x192xf32> to vector<8x192xf32>
    %287 = arith.truncf %282 : vector<8x64xf32> to vector<8x64xbf16>
    %cst_76 = arith.constant dense<0.000000e+00> : vector<8x192xf32>
    %288 = tpu.matmul %287, %0, %cst_76 {dimension_numbers = #tpu.dot_dimension_numbers<[1], [0], [0], [1], [0, 0, 1, 1], [], []>} : vector<8x64xbf16>, vector<64x192xbf16>, vector<8x192xf32> -> vector<8x192xf32>
    %289 = arith.addf %288, %4 : vector<8x192xf32>
    %290 = vector.extract_strided_slice %286 {offsets = [0, 0], sizes = [8, 128], strides = [1, 1]} : vector<8x192xf32> to vector<8x128xf32>
    %291 = vector.extract_strided_slice %262 {offsets = [0, 0], sizes = [8, 128], strides = [1, 1]} : vector<8x192xf32> to vector<8x128xf32>
    %292 = arith.addf %290, %291 : vector<8x128xf32>
    %293 = arith.negf %292 : vector<8x128xf32>
    %294 = math.exp %293 : vector<8x128xf32>
    %cst_77 = arith.constant 1.000000e+00 : f32
    %295 = vector.broadcast %cst_77 : f32 to vector<8x128xf32>
    %296 = arith.addf %295, %294 : vector<8x128xf32>
    %297 = arith.divf %295, %296 : vector<8x128xf32>
    %298 = vector.extract_strided_slice %297 {offsets = [0, 0], sizes = [8, 64], strides = [1, 1]} : vector<8x128xf32> to vector<8x64xf32>
    %299 = vector.extract_strided_slice %297 {offsets = [0, 64], sizes = [8, 64], strides = [1, 1]} : vector<8x128xf32> to vector<8x64xf32>
    %300 = vector.extract_strided_slice %286 {offsets = [0, 128], sizes = [8, 64], strides = [1, 1]} : vector<8x192xf32> to vector<8x64xf32>
    %301 = vector.extract_strided_slice %262 {offsets = [0, 128], sizes = [8, 64], strides = [1, 1]} : vector<8x192xf32> to vector<8x64xf32>
    %302 = arith.mulf %298, %301 : vector<8x64xf32>
    %303 = arith.addf %300, %302 : vector<8x64xf32>
    %304 = math.tanh %303 : vector<8x64xf32>
    %cst_78 = arith.constant 1.000000e+00 : f32
    %305 = vector.broadcast %cst_78 : f32 to vector<8x64xf32>
    %306 = arith.subf %305, %299 : vector<8x64xf32>
    %307 = arith.mulf %306, %304 : vector<8x64xf32>
    %308 = arith.mulf %299, %257 : vector<8x64xf32>
    %309 = arith.addf %307, %308 : vector<8x64xf32>
    %310 = arith.truncf %309 : vector<8x64xf32> to vector<8x64xbf16>
    %cst_79 = arith.constant dense<0.000000e+00> : vector<8x384xf32>
    %311 = tpu.matmul %310, %1, %cst_79 {dimension_numbers = #tpu.dot_dimension_numbers<[1], [0], [0], [1], [0, 0, 1, 1], [], []>} : vector<8x64xbf16>, vector<64x384xbf16>, vector<8x384xf32> -> vector<8x384xf32>
    %312 = arith.addf %311, %7 : vector<8x384xf32>
    %313 = vector.extract_strided_slice %312 {offsets = [0, 0], sizes = [8, 192], strides = [1, 1]} : vector<8x384xf32> to vector<8x192xf32>
    %314 = vector.extract_strided_slice %312 {offsets = [0, 192], sizes = [8, 192], strides = [1, 1]} : vector<8x384xf32> to vector<8x192xf32>
    %315 = vector.extract_strided_slice %313 {offsets = [0, 0], sizes = [8, 128], strides = [1, 1]} : vector<8x192xf32> to vector<8x128xf32>
    %316 = vector.extract_strided_slice %289 {offsets = [0, 0], sizes = [8, 128], strides = [1, 1]} : vector<8x192xf32> to vector<8x128xf32>
    %317 = arith.addf %315, %316 : vector<8x128xf32>
    %318 = arith.negf %317 : vector<8x128xf32>
    %319 = math.exp %318 : vector<8x128xf32>
    %cst_80 = arith.constant 1.000000e+00 : f32
    %320 = vector.broadcast %cst_80 : f32 to vector<8x128xf32>
    %321 = arith.addf %320, %319 : vector<8x128xf32>
    %322 = arith.divf %320, %321 : vector<8x128xf32>
    %323 = vector.extract_strided_slice %322 {offsets = [0, 0], sizes = [8, 64], strides = [1, 1]} : vector<8x128xf32> to vector<8x64xf32>
    %324 = vector.extract_strided_slice %322 {offsets = [0, 64], sizes = [8, 64], strides = [1, 1]} : vector<8x128xf32> to vector<8x64xf32>
    %325 = vector.extract_strided_slice %313 {offsets = [0, 128], sizes = [8, 64], strides = [1, 1]} : vector<8x192xf32> to vector<8x64xf32>
    %326 = vector.extract_strided_slice %289 {offsets = [0, 128], sizes = [8, 64], strides = [1, 1]} : vector<8x192xf32> to vector<8x64xf32>
    %327 = arith.mulf %323, %326 : vector<8x64xf32>
    %328 = arith.addf %325, %327 : vector<8x64xf32>
    %329 = math.tanh %328 : vector<8x64xf32>
    %cst_81 = arith.constant 1.000000e+00 : f32
    %330 = vector.broadcast %cst_81 : f32 to vector<8x64xf32>
    %331 = arith.subf %330, %324 : vector<8x64xf32>
    %332 = arith.mulf %331, %329 : vector<8x64xf32>
    %333 = arith.mulf %324, %282 : vector<8x64xf32>
    %334 = arith.addf %332, %333 : vector<8x64xf32>
    %335 = vector.extract_strided_slice %334 {offsets = [3, 0], sizes = [1, 64], strides = [1, 1]} : vector<8x64xf32> to vector<1x64xf32>
    %c5_82 = arith.constant 5 : index
    %c0_83 = arith.constant 0 : index
    %336 = vector.load %arg13[%c5_82, %c0_83] : memref<8x64xf32, #tpu.memory_space<vmem>>, vector<1x64xf32>
    tpu.vector_store %arg13[%c5_82, %c0_83], %335 {strides = array<i32>} : memref<8x64xf32, #tpu.memory_space<vmem>>, vector<1x64xf32>,
    %c6 = arith.constant 6 : index
    %c0_84 = arith.constant 0 : index
    %c0_85 = arith.constant 0 : index
    %337 = vector.load %arg12[%c6, %c0_84, %c0_85] : memref<8x8x192xf32, #tpu.memory_space<vmem>>, vector<1x8x192xf32>
    %338 = vector.shape_cast %337 : vector<1x8x192xf32> to vector<8x192xf32>
    %339 = arith.truncf %334 : vector<8x64xf32> to vector<8x64xbf16>
    %cst_86 = arith.constant dense<0.000000e+00> : vector<8x192xf32>
    %340 = tpu.matmul %339, %0, %cst_86 {dimension_numbers = #tpu.dot_dimension_numbers<[1], [0], [0], [1], [0, 0, 1, 1], [], []>} : vector<8x64xbf16>, vector<64x192xbf16>, vector<8x192xf32> -> vector<8x192xf32>
    %341 = arith.addf %340, %4 : vector<8x192xf32>
    %342 = vector.extract_strided_slice %338 {offsets = [0, 0], sizes = [8, 128], strides = [1, 1]} : vector<8x192xf32> to vector<8x128xf32>
    %343 = vector.extract_strided_slice %314 {offsets = [0, 0], sizes = [8, 128], strides = [1, 1]} : vector<8x192xf32> to vector<8x128xf32>
    %344 = arith.addf %342, %343 : vector<8x128xf32>
    %345 = arith.negf %344 : vector<8x128xf32>
    %346 = math.exp %345 : vector<8x128xf32>
    %cst_87 = arith.constant 1.000000e+00 : f32
    %347 = vector.broadcast %cst_87 : f32 to vector<8x128xf32>
    %348 = arith.addf %347, %346 : vector<8x128xf32>
    %349 = arith.divf %347, %348 : vector<8x128xf32>
    %350 = vector.extract_strided_slice %349 {offsets = [0, 0], sizes = [8, 64], strides = [1, 1]} : vector<8x128xf32> to vector<8x64xf32>
    %351 = vector.extract_strided_slice %349 {offsets = [0, 64], sizes = [8, 64], strides = [1, 1]} : vector<8x128xf32> to vector<8x64xf32>
    %352 = vector.extract_strided_slice %338 {offsets = [0, 128], sizes = [8, 64], strides = [1, 1]} : vector<8x192xf32> to vector<8x64xf32>
    %353 = vector.extract_strided_slice %314 {offsets = [0, 128], sizes = [8, 64], strides = [1, 1]} : vector<8x192xf32> to vector<8x64xf32>
    %354 = arith.mulf %350, %353 : vector<8x64xf32>
    %355 = arith.addf %352, %354 : vector<8x64xf32>
    %356 = math.tanh %355 : vector<8x64xf32>
    %cst_88 = arith.constant 1.000000e+00 : f32
    %357 = vector.broadcast %cst_88 : f32 to vector<8x64xf32>
    %358 = arith.subf %357, %351 : vector<8x64xf32>
    %359 = arith.mulf %358, %356 : vector<8x64xf32>
    %360 = arith.mulf %351, %309 : vector<8x64xf32>
    %361 = arith.addf %359, %360 : vector<8x64xf32>
    %362 = arith.truncf %361 : vector<8x64xf32> to vector<8x64xbf16>
    %cst_89 = arith.constant dense<0.000000e+00> : vector<8x384xf32>
    %363 = tpu.matmul %362, %1, %cst_89 {dimension_numbers = #tpu.dot_dimension_numbers<[1], [0], [0], [1], [0, 0, 1, 1], [], []>} : vector<8x64xbf16>, vector<64x384xbf16>, vector<8x384xf32> -> vector<8x384xf32>
    %364 = arith.addf %363, %7 : vector<8x384xf32>
    %365 = vector.extract_strided_slice %364 {offsets = [0, 0], sizes = [8, 192], strides = [1, 1]} : vector<8x384xf32> to vector<8x192xf32>
    %366 = vector.extract_strided_slice %364 {offsets = [0, 192], sizes = [8, 192], strides = [1, 1]} : vector<8x384xf32> to vector<8x192xf32>
    %367 = vector.extract_strided_slice %365 {offsets = [0, 0], sizes = [8, 128], strides = [1, 1]} : vector<8x192xf32> to vector<8x128xf32>
    %368 = vector.extract_strided_slice %341 {offsets = [0, 0], sizes = [8, 128], strides = [1, 1]} : vector<8x192xf32> to vector<8x128xf32>
    %369 = arith.addf %367, %368 : vector<8x128xf32>
    %370 = arith.negf %369 : vector<8x128xf32>
    %371 = math.exp %370 : vector<8x128xf32>
    %cst_90 = arith.constant 1.000000e+00 : f32
    %372 = vector.broadcast %cst_90 : f32 to vector<8x128xf32>
    %373 = arith.addf %372, %371 : vector<8x128xf32>
    %374 = arith.divf %372, %373 : vector<8x128xf32>
    %375 = vector.extract_strided_slice %374 {offsets = [0, 0], sizes = [8, 64], strides = [1, 1]} : vector<8x128xf32> to vector<8x64xf32>
    %376 = vector.extract_strided_slice %374 {offsets = [0, 64], sizes = [8, 64], strides = [1, 1]} : vector<8x128xf32> to vector<8x64xf32>
    %377 = vector.extract_strided_slice %365 {offsets = [0, 128], sizes = [8, 64], strides = [1, 1]} : vector<8x192xf32> to vector<8x64xf32>
    %378 = vector.extract_strided_slice %341 {offsets = [0, 128], sizes = [8, 64], strides = [1, 1]} : vector<8x192xf32> to vector<8x64xf32>
    %379 = arith.mulf %375, %378 : vector<8x64xf32>
    %380 = arith.addf %377, %379 : vector<8x64xf32>
    %381 = math.tanh %380 : vector<8x64xf32>
    %cst_91 = arith.constant 1.000000e+00 : f32
    %382 = vector.broadcast %cst_91 : f32 to vector<8x64xf32>
    %383 = arith.subf %382, %376 : vector<8x64xf32>
    %384 = arith.mulf %383, %381 : vector<8x64xf32>
    %385 = arith.mulf %376, %334 : vector<8x64xf32>
    %386 = arith.addf %384, %385 : vector<8x64xf32>
    %387 = vector.extract_strided_slice %386 {offsets = [3, 0], sizes = [1, 64], strides = [1, 1]} : vector<8x64xf32> to vector<1x64xf32>
    %c6_92 = arith.constant 6 : index
    %c0_93 = arith.constant 0 : index
    %388 = vector.load %arg13[%c6_92, %c0_93] : memref<8x64xf32, #tpu.memory_space<vmem>>, vector<1x64xf32>
    tpu.vector_store %arg13[%c6_92, %c0_93], %387 {strides = array<i32>} : memref<8x64xf32, #tpu.memory_space<vmem>>, vector<1x64xf32>,
    %c7 = arith.constant 7 : index
    %c0_94 = arith.constant 0 : index
    %c0_95 = arith.constant 0 : index
    %389 = vector.load %arg12[%c7, %c0_94, %c0_95] : memref<8x8x192xf32, #tpu.memory_space<vmem>>, vector<1x8x192xf32>
    %390 = vector.shape_cast %389 : vector<1x8x192xf32> to vector<8x192xf32>
    %391 = arith.truncf %386 : vector<8x64xf32> to vector<8x64xbf16>
    %cst_96 = arith.constant dense<0.000000e+00> : vector<8x192xf32>
    %392 = tpu.matmul %391, %0, %cst_96 {dimension_numbers = #tpu.dot_dimension_numbers<[1], [0], [0], [1], [0, 0, 1, 1], [], []>} : vector<8x64xbf16>, vector<64x192xbf16>, vector<8x192xf32> -> vector<8x192xf32>
    %393 = arith.addf %392, %4 : vector<8x192xf32>
    %394 = vector.extract_strided_slice %390 {offsets = [0, 0], sizes = [8, 128], strides = [1, 1]} : vector<8x192xf32> to vector<8x128xf32>
    %395 = vector.extract_strided_slice %366 {offsets = [0, 0], sizes = [8, 128], strides = [1, 1]} : vector<8x192xf32> to vector<8x128xf32>
    %396 = arith.addf %394, %395 : vector<8x128xf32>
    %397 = arith.negf %396 : vector<8x128xf32>
    %398 = math.exp %397 : vector<8x128xf32>
    %cst_97 = arith.constant 1.000000e+00 : f32
    %399 = vector.broadcast %cst_97 : f32 to vector<8x128xf32>
    %400 = arith.addf %399, %398 : vector<8x128xf32>
    %401 = arith.divf %399, %400 : vector<8x128xf32>
    %402 = vector.extract_strided_slice %401 {offsets = [0, 0], sizes = [8, 64], strides = [1, 1]} : vector<8x128xf32> to vector<8x64xf32>
    %403 = vector.extract_strided_slice %401 {offsets = [0, 64], sizes = [8, 64], strides = [1, 1]} : vector<8x128xf32> to vector<8x64xf32>
    %404 = vector.extract_strided_slice %390 {offsets = [0, 128], sizes = [8, 64], strides = [1, 1]} : vector<8x192xf32> to vector<8x64xf32>
    %405 = vector.extract_strided_slice %366 {offsets = [0, 128], sizes = [8, 64], strides = [1, 1]} : vector<8x192xf32> to vector<8x64xf32>
    %406 = arith.mulf %402, %405 : vector<8x64xf32>
    %407 = arith.addf %404, %406 : vector<8x64xf32>
    %408 = math.tanh %407 : vector<8x64xf32>
    %cst_98 = arith.constant 1.000000e+00 : f32
    %409 = vector.broadcast %cst_98 : f32 to vector<8x64xf32>
    %410 = arith.subf %409, %403 : vector<8x64xf32>
    %411 = arith.mulf %410, %408 : vector<8x64xf32>
    %412 = arith.mulf %403, %361 : vector<8x64xf32>
    %413 = arith.addf %411, %412 : vector<8x64xf32>
    %414 = arith.truncf %413 : vector<8x64xf32> to vector<8x64xbf16>
    %cst_99 = arith.constant dense<0.000000e+00> : vector<8x384xf32>
    %415 = tpu.matmul %414, %1, %cst_99 {dimension_numbers = #tpu.dot_dimension_numbers<[1], [0], [0], [1], [0, 0, 1, 1], [], []>} : vector<8x64xbf16>, vector<64x384xbf16>, vector<8x384xf32> -> vector<8x384xf32>
    %416 = arith.addf %415, %7 : vector<8x384xf32>
    %417 = vector.extract_strided_slice %416 {offsets = [0, 0], sizes = [8, 192], strides = [1, 1]} : vector<8x384xf32> to vector<8x192xf32>
    %418 = vector.extract_strided_slice %417 {offsets = [0, 0], sizes = [8, 128], strides = [1, 1]} : vector<8x192xf32> to vector<8x128xf32>
    %419 = vector.extract_strided_slice %393 {offsets = [0, 0], sizes = [8, 128], strides = [1, 1]} : vector<8x192xf32> to vector<8x128xf32>
    %420 = arith.addf %418, %419 : vector<8x128xf32>
    %421 = arith.negf %420 : vector<8x128xf32>
    %422 = math.exp %421 : vector<8x128xf32>
    %cst_100 = arith.constant 1.000000e+00 : f32
    %423 = vector.broadcast %cst_100 : f32 to vector<8x128xf32>
    %424 = arith.addf %423, %422 : vector<8x128xf32>
    %425 = arith.divf %423, %424 : vector<8x128xf32>
    %426 = vector.extract_strided_slice %425 {offsets = [0, 0], sizes = [8, 64], strides = [1, 1]} : vector<8x128xf32> to vector<8x64xf32>
    %427 = vector.extract_strided_slice %425 {offsets = [0, 64], sizes = [8, 64], strides = [1, 1]} : vector<8x128xf32> to vector<8x64xf32>
    %428 = vector.extract_strided_slice %417 {offsets = [0, 128], sizes = [8, 64], strides = [1, 1]} : vector<8x192xf32> to vector<8x64xf32>
    %429 = vector.extract_strided_slice %393 {offsets = [0, 128], sizes = [8, 64], strides = [1, 1]} : vector<8x192xf32> to vector<8x64xf32>
    %430 = arith.mulf %426, %429 : vector<8x64xf32>
    %431 = arith.addf %428, %430 : vector<8x64xf32>
    %432 = math.tanh %431 : vector<8x64xf32>
    %cst_101 = arith.constant 1.000000e+00 : f32
    %433 = vector.broadcast %cst_101 : f32 to vector<8x64xf32>
    %434 = arith.subf %433, %427 : vector<8x64xf32>
    %435 = arith.mulf %434, %432 : vector<8x64xf32>
    %436 = arith.mulf %427, %386 : vector<8x64xf32>
    %437 = arith.addf %435, %436 : vector<8x64xf32>
    %438 = vector.extract_strided_slice %437 {offsets = [3, 0], sizes = [1, 64], strides = [1, 1]} : vector<8x64xf32> to vector<1x64xf32>
    %c7_102 = arith.constant 7 : index
    %c0_103 = arith.constant 0 : index
    %439 = vector.load %arg13[%c7_102, %c0_103] : memref<8x64xf32, #tpu.memory_space<vmem>>, vector<1x64xf32>
    tpu.vector_store %arg13[%c7_102, %c0_103], %438 {strides = array<i32>} : memref<8x64xf32, #tpu.memory_space<vmem>>, vector<1x64xf32>,
    %c0_104 = arith.constant 0 : index
    %c0_105 = arith.constant 0 : index
    %440 = vector.load %arg13[%c0_104, %c0_105] : memref<8x64xf32, #tpu.memory_space<vmem>>, vector<8x64xf32>
    %441 = arith.truncf %440 : vector<8x64xf32> to vector<8x64xbf16>
    %c0_106 = arith.constant 0 : index
    %c0_107 = arith.constant 0 : index
    %442 = vector.load %arg8[%c0_106, %c0_107] : memref<64x12xbf16, #tpu.memory_space<vmem>>, vector<64x12xbf16>
    %cst_108 = arith.constant dense<0.000000e+00> : vector<8x12xf32>
    %443 = tpu.matmul %441, %442, %cst_108 {dimension_numbers = #tpu.dot_dimension_numbers<[1], [0], [0], [1], [0, 0, 1, 1], [], []>} : vector<8x64xbf16>, vector<64x12xbf16>, vector<8x12xf32> -> vector<8x12xf32>
    %c0_109 = arith.constant 0 : index
    %c0_110 = arith.constant 0 : index
    %444 = vector.load %arg9[%c0_109, %c0_110] : memref<1x12xf32, #tpu.memory_space<vmem>>, vector<1x12xf32>
    %445 = vector.broadcast %444 : vector<1x12xf32> to vector<8x12xf32>
    %446 = arith.addf %443, %445 : vector<8x12xf32>
    %cst_111 = arith.constant dense<0xFF800000> : vector<8xf32>
    %447 = vector.multi_reduction <maximumf>, %446, %cst_111 [1] : vector<8x12xf32> to vector<8xf32>
    %448 = vector.shape_cast %447 : vector<8xf32> to vector<8x1xf32>
    %449 = vector.broadcast %448 : vector<8x1xf32> to vector<8x12xf32>
    %450 = arith.subf %446, %449 : vector<8x12xf32>
    %451 = math.exp %450 : vector<8x12xf32>
    %cst_112 = arith.constant dense<0.000000e+00> : vector<8xf32>
    %452 = vector.multi_reduction <add>, %451, %cst_112 [1] : vector<8x12xf32> to vector<8xf32>
    %453 = vector.shape_cast %452 : vector<8xf32> to vector<8x1xf32>
    %454 = tpu.reciprocal %453 {approx = true} : vector<8x1xf32> -> vector<8x1xf32>
    %455 = vector.broadcast %454 : vector<8x1xf32> to vector<8x12xf32>
    %456 = arith.mulf %451, %455 : vector<8x12xf32>
    %c0_113 = arith.constant 0 : index
    %c0_114 = arith.constant 0 : index
    %457 = vector.load %arg10[%c0_113, %c0_114] : memref<8x12xf32, #tpu.memory_space<vmem>>, vector<8x12xf32>
    tpu.vector_store %arg10[%c0_113, %c0_114], %456 {strides = array<i32>} : memref<8x12xf32, #tpu.memory_space<vmem>>, vector<8x12xf32>,
    %c0_115 = arith.constant 0 : index
    %c0_116 = arith.constant 0 : index
    %c0_117 = arith.constant 0 : index
    %458 = vector.load %arg11[%c0_115, %c0_116, %c0_117] : memref<2x8x64xf32, #tpu.memory_space<vmem>>, vector<1x8x64xf32>
    %459 = vector.shape_cast %458 : vector<1x8x64xf32> to vector<8x64xf32>
    %460 = vector.shape_cast %413 : vector<8x64xf32> to vector<1x8x64xf32>
    tpu.vector_store %arg11[%c0_115, %c0_116, %c0_117], %460 {strides = array<i32>} : memref<2x8x64xf32, #tpu.memory_space<vmem>>, vector<1x8x64xf32>,
    %c1_118 = arith.constant 1 : index
    %c0_119 = arith.constant 0 : index
    %c0_120 = arith.constant 0 : index
    %461 = vector.load %arg11[%c1_118, %c0_119, %c0_120] : memref<2x8x64xf32, #tpu.memory_space<vmem>>, vector<1x8x64xf32>
    %462 = vector.shape_cast %461 : vector<1x8x64xf32> to vector<8x64xf32>
    %463 = vector.shape_cast %437 : vector<8x64xf32> to vector<1x8x64xf32>
    tpu.vector_store %arg11[%c1_118, %c0_119, %c0_120], %463 {strides = array<i32>} : memref<2x8x64xf32, #tpu.memory_space<vmem>>, vector<1x8x64xf32>,
    return
  }
}

</mosaic_0001>

<bundles_post_ra>
// kernel: policy_forward.1
= control target key start
LH: loop header
LB: loop body
LE: loop exit
PB: predicated region body
PF: predicated region fallthrough
CT: control target
= control target key end

     0   :  { %17 = vsyncpa [#allocation5], 0  ;;  %s3490_s0 = inlined_call_operand.vmem [shape: f32[64,32], index: 0, kind: input, shape index: {}]   ;;  %s3491_s1 = inlined_call_operand.vmem [shape: f32[2,8,64], index: 1, kind: input, shape index: {}, may-alias: {1,11}]   ;;  %s3492_s2 = inlined_call_operand.vmem [shape: bf16[32,192], index: 2, kind: input, shape index: {}]   ;;  %s3493_s3 = inlined_call_operand.hbm [shape: f32[1,192], index: 3, kind: input, shape index: {}]   ;;  %s3494_s4 = inlined_call_operand.vmem [shape: bf16[64,192], index: 4, kind: input, shape index: {}]   ;;  %s3495_s5 = inlined_call_operand.hbm [shape: f32[1,192], index: 5, kind: input, shape index: {}]   ;;  %s3496_s6 = inlined_call_operand.vmem [shape: bf16[64,384], index: 6, kind: input, shape index: {}]   ;;  %s3497_s7 = inlined_call_operand.vmem [shape: f32[1,384], index: 7, kind: input, shape index: {}]   ;;  %s3498_s8 = inlined_call_operand.vmem [shape: bf16[64,12], index: 8, kind: input, shape index: {}]   ;;  %s3499_s9 = inlined_call_operand.hbm [shape: f32[1,12], index: 9, kind: input, shape index: {}]   ;;  %s3500_s10 = inlined_call_operand.hbm [shape: f32[8,12], index: 10, kind: output, shape index: {0}]   ;;  %s3501_s11 = inlined_call_operand.vmem [shape: f32[2,8,64], index: 11, kind: output, shape index: {1}, may-alias: {1,11}]  }
   0x1   :  { %18 = vsyncpa [#allocation8], 0 }
   0x2   :  { %19 = vsyncpa [#allocation6], 0  ;;  %s2561_s17 = smov [#allocation7]   ;;  %s2562_s19 = smov [#allocation4]  }
   0x3   :  { %s44_s18 = sshll.u32 %s2561_s17, 4  ;;  %s32_s20 = sshll.u32 %s2562_s19, 4  ;;  %s45_s18 = int_to_ptr.vmem [resolvable:$true] %s44_s18  ;;  %s33_s20 = int_to_ptr.vmem [resolvable:$true] %s32_s20 }
   0x4   :  { %s2467_s23 = scalar_lea.hbm %s3495_s5, 32 }
   0x5   :  { %p2468_p0 = scmp.ne.s32.totalorder %s3495_s5, %s2467_s23  ;;  %p2471_p1 = scmp.lt.u32.totalorder %s2467_s23, %s3495_s5 }
   0x7   :  { %p2473_p2 = pnand %p2471_p1, %p2468_p0 }
   0x9   :  { %2476 = shalt.err (!%p2473_p2)
}
   0xa   :  { %s2477_s28 = scalar_lea.vmem %s45_s18, 32  ;;  %p2482_p4 = scmp.lt.s32.totalorder %s45_s18, %s45_s18 }
   0xb   :  { %p2478_p3 = scmp.ne.s32.totalorder %s45_s18, %s2477_s28  ;;  %p2483_p5 = scmp.lt.s32.totalorder %s2477_s28, %s2477_s28 }
   0xd   :  { %p2484_p6 = por %p2483_p5, %p2482_p4 }
   0xf   :  { %p2485_p7 = pnand %p2484_p6, %p2478_p3 }
  0x11   :  { %2488 = shalt.err (!%p2485_p7)
}
  0x12   :  { %47 = dma.hbm_to_vmem [thread:$0]  %s3495_s5, 32, %s45_s18, [#allocation8]  }
  0x13   :  { %s2489_s14 = scalar_lea.hbm %s3493_s3, 32 }
  0x14   :  { %p2490_p8 = scmp.ne.s32.totalorder %s3493_s3, %s2489_s14  ;;  %p2493_p9 = scmp.lt.u32.totalorder %s2489_s14, %s3493_s3 }
  0x16   :  { %p2495_p10 = pnand %p2493_p9, %p2490_p8 }
  0x18   :  { %2498 = shalt.err (!%p2495_p10)
}
  0x19   :  { %s2499_s21 = scalar_lea.vmem %s33_s20, 32  ;;  %p2504_p12 = scmp.lt.s32.totalorder %s33_s20, %s33_s20 }
  0x1a   :  { %p2500_p11 = scmp.ne.s32.totalorder %s33_s20, %s2499_s21  ;;  %p2505_p13 = scmp.lt.s32.totalorder %s2499_s21, %s2499_s21 }
  0x1c   :  { %p2506_p0 = por %p2505_p13, %p2504_p12 }
  0x1e   :  { %p2507_p1 = pnand %p2506_p0, %p2500_p11 }
  0x20   :  { %2510 = shalt.err (!%p2507_p1)
}
  0x21   :  { %35 = dma.hbm_to_vmem [thread:$0]  %s3493_s3, 32, %s33_s20, [#allocation5]  }
  0x22   :  { %s2563_s22 = smov [#allocation9]   ;;  %s2511_s26 = scalar_lea.hbm %s3499_s9, 16 }
  0x23   :  { %s60_s23 = sshll.u32 %s2563_s22, 4  ;;  %p2512_p2 = scmp.ne.s32.totalorder %s3499_s9, %s2511_s26  ;;  %s61_s23 = int_to_ptr.vmem [resolvable:$true] %s60_s23 }
  0x24   :  { %p2515_p3 = scmp.lt.u32.totalorder %s2511_s26, %s3499_s9 }
  0x26   :  { %p2517_p4 = pnand %p2515_p3, %p2512_p2 }
  0x28   :  { %2520 = shalt.err (!%p2517_p4)
}
  0x29   :  { %s2521_s12 = scalar_lea.vmem %s61_s23, 16  ;;  %s2525_s3 = scalar_lea.vmem %s61_s23, 32 }
  0x2a   :  { %p2522_p5 = scmp.ne.s32.totalorder %s61_s23, %s2521_s12  ;;  %p2526_p6 = scmp.lt.s32.totalorder %s61_s23, %s61_s23 }
  0x2b   :  { %p2527_p7 = scmp.lt.s32.totalorder %s2525_s3, %s2521_s12 }
  0x2d   :  { %p2528_p8 = por %p2527_p7, %p2526_p6 }
  0x2f   :  { %p2529_p9 = pnand %p2528_p8, %p2522_p5 }
  0x31   :  { %2532 = shalt.err (!%p2529_p9)
}
  0x32   :  { %63 = dma.hbm_to_vmem [thread:$0]  %s3499_s9, 16, %s61_s23, [#allocation8]  }
  0x33   :  { %2555 = dma.done.wait [#allocation5], 32  }
  0x34   :  { %2556 = vsyncadd [#allocation5], 4294967264 }
  0x35   :  { %2557 = dma.done.wait [#allocation8], 48  }
  0x36   :  { %2558 = vsyncadd [#allocation8], 4294967248  ;;  %v2564_v0 = vmov 0   ;;  %v2670_v1 = vld [vmem:[%s3496_s6 + $0x4] ss:$12 sps:$4 sm:$0xff]   ;;  %v128_v15 = vld [vmem:[%s3490_s0 + $0x8] sm:$0xff]  ;;  %v100_v23 = vlaneseq }
  0x37   :  { %381 = vmatprep.mubr.bf16.mxu1 %v2564_v0  ;;  %220 = vmatprep.mubr.bf16.mxu0 %v2564_v0  ;;  %v2675_v2 = vld [vmem:[%s3496_s6] ss:$12 sps:$4 sm:$0xff]   ;;  %v2681_v3 = vld [vmem:[%s3496_s6 + $0x1c] ss:$12 sps:$4 sm:$0xff]   ;;  %v2687_v4 = vld [vmem:[%s3496_s6 + $0x18] ss:$12 sps:$4 sm:$0xff]  }
  0x38   :  { %349 = vmatprep.subr.bf16.mxu1 %v2670_v1  ;;  %v2693_v5 = vld [vmem:[%s3496_s6 + $0x34] ss:$12 sps:$4 sm:$0xff]   ;;  %v2699_v6 = vld [vmem:[%s3496_s6 + $0x30] ss:$12 sps:$4 sm:$0xff]   ;;  %v2705_v7 = vld [vmem:[%s3496_s6 + $0x4c] ss:$12 sps:$4 sm:$0xff]  }
  0x39   :  { %350 = vmatpush1.bf16.msra.mxu1 %v2675_v2  ;;  %v2710_v8 = vld [vmem:[%s3496_s6 + $0x48] ss:$12 sps:$4 sm:$0xff]   ;;  %v2715_v9 = vld [vmem:[%s3491_s1] sm:$0xff]  ;;  %v2329_v13 = vld [vmem:[%s3492_s2 + $0x10] ss:$8 sps:$4 sm:$0xff]   ;;  %vm262_vm0 = vcmask 523264  }
  0x3a   :  { %351 = vmatprep.subr.bf16.mxu1 %v2681_v3  ;;  %v2324_v10 = vld [vmem:[%s3492_s2 + $0x4] ss:$8 sps:$4 sm:$0xff]   ;;  %v2326_v11 = vld [vmem:[%s3492_s2] ss:$8 sps:$4 sm:$0xff]   ;;  %v2327_v12 = vld [vmem:[%s3492_s2 + $0x14] ss:$8 sps:$4 sm:$0xff]   ;;  %v281_v17 = vpack.c.bf16 %v2715_v9, %v2715_v9 }
  0x3b   :  { %188 = vmatprep.subr.bf16.mxu0 %v2324_v10  ;;  %v127_v14 = vld [vmem:[%s3490_s0] sm:$0xff]  ;;  %v2740_v16 = vld [vmem:[%s3496_s6 + $0x8] ss:$12 sps:$4 sm:$0xff]   ;;  %vm175_vm1 = vcmask 261120   ;;  %v2565_v18 = vmov 0.0   ;;  %vm2566_vm2 = vmmov 0  }
  0x3c   :  { %189 = vmatpush1.bf16.msra.mxu0 %v2326_v11  ;;  %v135_v19 = vpack.c.bf16 %v128_v15, %v127_v14  ;;  %v2751_v20 = vld [vmem:[%s3496_s6 + $0x20] ss:$12 sps:$4 sm:$0xff]   ;;  %v2762_v21 = vld [vmem:[%s3496_s6 + $0x38] ss:$12 sps:$4 sm:$0xff]   ;;  %v2769_v22 = vld [vmem:[%s3496_s6 + $0x50] ss:$12 sps:$4 sm:$0xff]  }
  0x3d   :  { %352 = vmatpush1.bf16.msra.mxu1 %v2687_v4  ;;  %190 = vmatprep.subr.bf16.mxu0 %v2327_v12  ;;  %v101_v24 = vshrl.u32 %v100_v23, 7  ;;  %v2788_v26 = vld [vmem:[%s3497_s7] sm:$0x7]  ;;  %v143_v28 = vld [vmem:[#allocation4] sm:$0x3]  ;;  %s2567_s7 = smov 64  }
  0x3e   :  { %353 = vmatprep.subr.bf16.mxu1 %v2693_v5  ;;  %v2821_v63 = vld [vmem:[%s3494_s4 + $0x4] ss:$8 sps:$4 sm:$0xff]   ;;  %v2826_v10 = vld [vmem:[%s3494_s4] ss:$8 sps:$4 sm:$0xff]   ;;  %v129_v11 = vld [vmem:[%s3490_s0 + $0x10] sm:$0xff]  ;;  %vm661_vm3 = vcmask 519171  }
  0x3f   :  { %v2783_v25 = vsub.s32 1, %v101_v24  ;;  %v2790_v27 = vsub.s32 0, %v101_v24  ;;  %v122_v45 = vsub.s32 2, %v101_v24  ;;  %v130_v12 = vld [vmem:[%s3490_s0 + $0x18] sm:$0xff]  ;;  %v131_v23 = vld [vmem:[%s3490_s0 + $0x20] sm:$0xff]  ;;  %v132_v24 = vld [vmem:[%s3490_s0 + $0x28] sm:$0xff] }
  0x40   :  { %191 = vmatpush1.bf16.msra.mxu0 %v2329_v13  ;;  %v2837_v13 = vld [vmem:[%s3494_s4 + $0x14] ss:$8 sps:$4 sm:$0xff]   ;;  %v136_v15 = vpack.c.bf16 %v130_v12, %v129_v11  ;;  %vm2030_vm4 = vcmask 97280  }
  0x41   :  { %354 = vmatpush1.bf16.msra.mxu1 %v2699_v6  ;;  %v2794_v29 = vrot.slane %v2788_v26, %v2783_v25  ;;  %v2797_v30 = vrot.slane %v143_v28, %v2790_v27  ;;  %v2800_v32 = vrot.slane %v143_v28, %v2783_v25  ;;  %v2813_v46 = vrot.slane %v2788_v26, %v122_v45  ;;  %v2868_v28 = vld [vmem:[%s3494_s4 + $0x20] ss:$8 sps:$4 sm:$0xff]  }
  0x42   :  { %355 = vmatprep.subr.bf16.mxu1 %v2705_v7  ;;  %475 = vmatprep.subr.bf16.mxu0 %v2821_v63 }
  0x43   :  { %2074 = vmatmul.mubr.msk.bf16.vlgmr.msra.gmra.mrb[0].mxu0 %vm175_vm1, %v135_v19  ;;  %v2853_v19 = vld [vmem:[%s3494_s4 + $0x24] ss:$8 sps:$4 sm:$0xff]  }
  0x44   :  { %230 = vmatprep.mubr.bf16.mxu0 %v2564_v0  ;;  %476 = vmatpush1.bf16.msra.mxu0 %v2826_v10 }
  0x45   :  { %356 = vmatpush1.bf16.msra.mxu1 %v2710_v8  ;;  %477 = vmatprep.subr.bf16.mxu0 %v2837_v13 }
  0x46   :  { %2192 = vmatprep.subr.bf16.mxu1 %v2565_v18 }
  0x48   :  { %2091 = vmatmul.mubr.msk.bf16.vlgmr.msra.gmra.mrb[0].mxu1 %vm262_vm0, %v281_v17 }
  0x49   :  { %2193 = vmatpush3.bf16.msra.mxu1 %v2740_v16  ;;  %2200 = vmatprep.mubr.msk.bf16.mxu1 %vm2566_vm2, %v2565_v18 }
  0x4a   :  { %2194 = vmatprep.subr.bf16.mxu1 %v2565_v18 }
  0x4b   :  { %2075 = vmatmul.mubr.msk.bf16.gmra.mrb[4].mxu0 %vm175_vm1, %v136_v15 }
  0x4c   :  { %240 = vmatprep.mubr.bf16.mxu0 %v2564_v0 }
  0x4d   :  { %2195 = vmatpush3.bf16.msra.mxu1 %v2751_v20 }
  0x4e   :  { %2196 = vmatprep.subr.bf16.mxu1 %v2565_v18 }
  0x51   :  { %2197 = vmatpush3.bf16.msra.mxu1 %v2762_v21 }
  0x52   :  { %2198 = vmatprep.subr.bf16.mxu1 %v2565_v18 }
  0x55   :  { %2199 = vmatpush3.bf16.msra.mxu1 %v2769_v22 }
  0x56   :  { %554 = vmatprep.subr.bf16.mxu1 %v2670_v1 }
  0x58   :  { %2201 = vmatmul.mubr.msk.bf16.vlgmr.msra.gmra.mrb[4].mxu1 %vm262_vm0, %v281_v17  ;;  %v2846_v17 = vld [vmem:[%s3494_s4 + $0x10] ss:$8 sps:$4 sm:$0xff]  }
  0x59   :  { %555 = vmatpush1.bf16.msra.mxu1 %v2675_v2  ;;  %586 = vmatprep.mubr.bf16.mxu1 %v2564_v0 }
  0x5a   :  { %556 = vmatprep.subr.bf16.mxu1 %v2681_v3  ;;  %478 = vmatpush1.bf16.msra.mxu0 %v2846_v17 }
  0x5b   :  { %479 = vmatprep.subr.bf16.mxu0 %v2853_v19 }
  0x5d   :  { %557 = vmatpush1.bf16.msra.mxu1 %v2687_v4 }
  0x5e   :  { %558 = vmatprep.subr.bf16.mxu1 %v2693_v5  ;;  %480 = vmatpush1.bf16.msra.mxu0 %v2868_v28 }
  0x61   :  { %559 = vmatpush1.bf16.msra.mxu1 %v2699_v6 }
  0x62   :  { %560 = vmatprep.subr.bf16.mxu1 %v2705_v7 }
  0x65   :  { %561 = vmatpush1.bf16.msra.mxu1 %v2710_v8 }
  0x66   :  { %673 = vmatprep.subr.bf16.mxu1 %v2821_v63 }
 0x116   :  { %v222_v36 = vpop.f32.mrb[0].mxu0 }
 0x117   :  { %v223_v38 = vadd.f32 %v222_v36, %v2797_v30  ;;  %v224_v39 = vpop.f32.mrb[1].mxu0 }
 0x118   :  { %v225_v40 = vadd.f32 %v224_v39, %v2800_v32  ;;  %v226_v41 = vpop.f32.mrb[2].mxu0 }
 0x119   :  { %v2807_v42 = vadd.f32 %v226_v41, %v2797_v30  ;;  %v228_v43 = vpop.f32.mrb[3].mxu0 }
 0x11a   :  { %263 = vst.msk [vmem:[#allocation2 + $0x8] sm:$0xff] %vm262_vm0, %v225_v40  ;;  %v229_v44 = vadd.f32 %v228_v43, %v2800_v32 }
 0x11b   :  { %v383_v31 = vpop.f32.mrb[0].mxu1 }
 0x11c   :  { %v384_v33 = vpop.f32.mrb[1].mxu1  ;;  %265 = vst.msk [vmem:[#allocation2 + $0x18] sm:$0xff] %vm262_vm0, %v229_v44  ;;  %v137_v31 = vpack.c.bf16 %v132_v24, %v131_v23 }
 0x11d   :  { %v385_v34 = vadd.f32 %v384_v33, %v2794_v29  ;;  %v386_v35 = vpop.f32.mrb[2].mxu1  ;;  %v2874_v33 = vld [vmem:[%s3494_s4 + $0x34] ss:$8 sps:$4 sm:$0xff]  }
 0x11e   :  { %v387_v37 = vpop.f32.mrb[3].mxu1  ;;  %2076 = vmatmul.mubr.msk.bf16.gmra.mrb[8].mxu0 %vm175_vm1, %v137_v31  ;;  %481 = vmatprep.subr.bf16.mxu0 %v2874_v33  ;;  %v134_v35 = vld [vmem:[%s3490_s0 + $0x38] sm:$0xff] }
 0x11f   :  { %518 = vrot.lane.b32.xlu0 %v385_v34, %s2567_s7  ;;  %250 = vmatprep.mubr.bf16.mxu0 %v2564_v0  ;;  %v133_v34 = vld [vmem:[%s3490_s0 + $0x30] sm:$0xff]  ;;  %v2898_v37 = vld [vmem:[%s3491_s1 + $0x8] sm:$0xff] }
 0x120   :  { %v138_v36 = vpack.c.bf16 %v134_v35, %v133_v34 }
 0x121   :  { %v430_v61 = vld [vmem:[#allocation2 + $0x8] sm:$0xff] }
 0x126   :  { %2077 = vmatmul.mubr.msk.bf16.gmra.mrb[12].mxu0 %vm175_vm1, %v138_v36 }
 0x127   :  { %507 = vmatprep.mubr.bf16.mxu0 %v2564_v0 }
 0x12b   :  { %v423_v47 = vpop.f32.mrb[4].mxu1 }
 0x12c   :  { %v424_v48 = vadd.f32 %v423_v47, %v2813_v46  ;;  %v2202_v49 = vpop.f32.mrb[5].mxu1 }
 0x12d   :  { %v426_v50 = vpop.f32.mrb[6].mxu1 }
 0x12e   :  { %v2203_v51 = vpop.f32.mrb[7].mxu1  ;;  %520 = vrot.lane.b32.xlu0 %v424_v48, %s2567_s7  ;;  %v232_v48 = vpop.f32.mrb[4].mxu0 }
 0x12f   :  { %v2919_v49 = vadd.f32 %v232_v48, %v2797_v30  ;;  %v234_v50 = vpop.f32.mrb[5].mxu0 }
 0x130   :  { %v235_v51 = vadd.f32 %v234_v50, %v2800_v32 }
 0x132   :  { %267 = vst.msk [vmem:[#allocation2 + $0x28] sm:$0xff] %vm262_vm0, %v235_v51 }
 0x191   :  { %v519_v52 = vpop.permute.xlu0 %518 }
 0x1a0   :  { %v521_v53 = vpop.permute.xlu0 %520 }
 0x1a1   :  { %v522_v54 = vsel %vm262_vm0, %v519_v52, %v521_v53  ;;  %v236_v52 = vpop.f32.mrb[6].mxu0 }
 0x1a2   :  { %v524_v55 = vadd.f32 %v522_v54, %v223_v38  ;;  %v431_v38 = vpack.c.bf16 %v2898_v37, %v2898_v37  ;;  %v238_v54 = vpop.f32.mrb[7].mxu0 }
 0x1a4   :  { %v2102_v56 = vmul.f32 -1.442695, %v524_v55  ;;  %v239_v55 = vadd.f32 %v238_v54, %v2800_v32 }
 0x1a6   :  { %2346 = vpow2.f32 %v2102_v56  ;;  %269 = vst.msk [vmem:[#allocation2 + $0x38] sm:$0xff] %vm262_vm0, %v239_v55 }
 0x1b0   :  { %v2347_v57 = vpop.eup %2346 }
 0x1b1   :  { %v528_v58 = vadd.f32 1.0, %v2347_v57 }
 0x1b3   :  { %2348 = vrcp.f32 %v528_v58 }
 0x1bd   :  { %v2349_v59 = vpop.eup %2348 }
 0x1be   :  { %v532_v60 = vmul.f32 %v2349_v59, %v521_v53  ;;  %v535_v40 = vsub.f32 1.0, %v2349_v59  ;;  %v2923_v53 = vadd.f32 %v236_v52, %v2797_v30 }
 0x1c0   :  { %v533_v62 = vadd.f32 %v532_v60, %v430_v61 }
 0x1c2   :  { %2350 = vtanh.f32 %v533_v62 }
 0x1cc   :  { %v2351_v14 = vpop.eup %2350 }
 0x1cd   :  { %537 = vrot.lane.b32.xlu1 %v2351_v14, %s2567_s7 }
 0x1d1   :  { %542 = vrot.lane.b32.xlu1 %v2715_v9, %s2567_s7  ;;  %v2880_v9 = vld [vmem:[%s3494_s4 + $0x30] ss:$8 sps:$4 sm:$0xff]  }
 0x1d2   :  { %482 = vmatpush1.bf16.msra.mxu0 %v2880_v9 }
 0x1d3   :  { %2204 = vmatprep.subr.bf16.mxu0 %v2565_v18 }
 0x1d5   :  { %2101 = vmatmul.mubr.msk.bf16.vlgmr.msra.gmra.mrb[16].mxu0 %vm262_vm0, %v431_v38 }
 0x1d6   :  { %2205 = vmatpush3.bf16.msra.mxu0 %v2740_v16  ;;  %2212 = vmatprep.mubr.msk.bf16.mxu0 %vm2566_vm2, %v2565_v18 }
 0x1d7   :  { %2206 = vmatprep.subr.bf16.mxu0 %v2565_v18 }
 0x1da   :  { %2207 = vmatpush3.bf16.msra.mxu0 %v2751_v20 }
 0x1db   :  { %2208 = vmatprep.subr.bf16.mxu0 %v2565_v18 }
 0x1de   :  { %2209 = vmatpush3.bf16.msra.mxu0 %v2762_v21 }
 0x1df   :  { %2210 = vmatprep.subr.bf16.mxu0 %v2565_v18 }
 0x1e2   :  { %2211 = vmatpush3.bf16.msra.mxu0 %v2769_v22 }
 0x1e3   :  { %748 = vmatprep.subr.bf16.mxu0 %v2670_v1 }
 0x1f1   :  { %v242_v56 = vpop.f32.mrb[8].mxu0 }
 0x1f2   :  { %v2929_v57 = vadd.f32 %v242_v56, %v2797_v30  ;;  %v244_v58 = vpop.f32.mrb[9].mxu0 }
 0x1f3   :  { %v246_v60 = vpop.f32.mrb[10].mxu0 }
 0x1f4   :  { %v2933_v61 = vadd.f32 %v246_v60, %v2797_v30  ;;  %v248_v62 = vpop.f32.mrb[11].mxu0 }
 0x1f5   :  { %v249_v11 = vadd.f32 %v248_v62, %v2800_v32 }
 0x1f7   :  { %273 = vst.msk [vmem:[#allocation2 + $0x58] sm:$0xff] %vm262_vm0, %v249_v11 }
 0x1f9   :  { %v252_v12 = vpop.f32.mrb[12].mxu0 }
 0x1fa   :  { %v253_v14 = vadd.f32 %v252_v12, %v2797_v30  ;;  %v254_v15 = vpop.f32.mrb[13].mxu0 }
 0x1fb   :  { %v255_v23 = vadd.f32 %v254_v15, %v2800_v32  ;;  %v256_v24 = vpop.f32.mrb[14].mxu0 }
 0x1fc   :  { %274 = vst [vmem:[#allocation2 + $0x60] sm:$0xff] %v253_v14  ;;  %v257_v31 = vadd.f32 %v256_v24, %v2797_v30  ;;  %v258_v34 = vpop.f32.mrb[15].mxu0  ;;  %v98_v30 = vld [vmem:[#allocation7] sm:$0x3] }
 0x1fd   :  { %275 = vst.msk [vmem:[#allocation2 + $0x68] sm:$0xff] %vm262_vm0, %v255_v23  ;;  %v259_v35 = vadd.f32 %v258_v34, %v2800_v32  ;;  %v2980_v12 = vrot.slane %v98_v30, %v2783_v25 }
 0x1fe   :  { %276 = vst [vmem:[#allocation2 + $0x70] sm:$0xff] %v257_v31 }
 0x1ff   :  { %277 = vst.msk [vmem:[#allocation2 + $0x78] sm:$0xff] %vm262_vm0, %v259_v35 }
 0x23f   :  { %v538_v39 = vpop.permute.xlu1 %537 }
 0x240   :  { %v540_v43 = vmul.f32 %v538_v39, %v535_v40 }
 0x243   :  { %v543_v41 = vpop.permute.xlu1 %542 }
 0x244   :  { %v545_v44 = vmul.f32 %v2349_v59, %v543_v41  ;;  %v245_v59 = vadd.f32 %v244_v58, %v2800_v32  ;;  %v2965_v32 = vrot.slane %v98_v30, %v2790_v27  ;;  %v665_v30 = vld [vmem:[#allocation2 + $0x18] sm:$0xff] }
 0x246   :  { %v2913_v45 = vadd.f32 %v545_v44, %v540_v43  ;;  %271 = vst.msk [vmem:[#allocation2 + $0x48] sm:$0xff] %vm262_vm0, %v245_v59  ;;  %v2969_v43 = vrot.slane %v2788_v26, %v2790_v27 }
 0x248   :  { %v547_v47 = vpack.c.bf16 %v2913_v45, %v2913_v45 }
 0x24a   :  { %549 = vrot.lane.b32.xlu0 %v547_v47, %s2567_s7 }
 0x2a8   :  { %v509_v36 = vpop.f32.mrb[16].mxu0 }
 0x2a9   :  { %v511_v38 = vpop.f32.mrb[17].mxu0  ;;  %v510_v48 = vadd.f32 %v509_v36, %v2965_v32 }
 0x2aa   :  { %v513_v39 = vpop.f32.mrb[18].mxu0  ;;  %v512_v14 = vadd.f32 %v511_v38, %v2980_v12 }
 0x2ab   :  { %v514_v41 = vpop.f32.mrb[19].mxu0 }
 0x2bc   :  { %v550_v40 = vpop.permute.xlu0 %549 }
 0x2bd   :  { %2103 = vmatmul.mubr.msk.bf16.vlgmr.msra.gmra.mrb[8].mxu1 %vm262_vm0, %v550_v40  ;;  %2213 = vmatmul.mubr.msk.bf16.vlgmr.msra.gmra.mrb[20].mxu0 %vm262_vm0, %v550_v40 }
 0x2be   :  { %674 = vmatpush1.bf16.msra.mxu1 %v2826_v10  ;;  %705 = vmatprep.mubr.bf16.mxu1 %v2564_v0 }
 0x2bf   :  { %675 = vmatprep.subr.bf16.mxu1 %v2837_v13  ;;  %749 = vmatpush1.bf16.msra.mxu0 %v2675_v2 }
 0x2c0   :  { %750 = vmatprep.subr.bf16.mxu0 %v2681_v3  ;;  %780 = vmatprep.mubr.bf16.mxu0 %v2564_v0 }
 0x2c2   :  { %676 = vmatpush1.bf16.msra.mxu1 %v2846_v17 }
 0x2c3   :  { %677 = vmatprep.subr.bf16.mxu1 %v2853_v19  ;;  %751 = vmatpush1.bf16.msra.mxu0 %v2687_v4 }
 0x2c4   :  { %752 = vmatprep.subr.bf16.mxu0 %v2693_v5 }
 0x2c6   :  { %678 = vmatpush1.bf16.msra.mxu1 %v2868_v28 }
 0x2c7   :  { %679 = vmatprep.subr.bf16.mxu1 %v2874_v33  ;;  %753 = vmatpush1.bf16.msra.mxu0 %v2699_v6 }
 0x2c8   :  { %754 = vmatprep.subr.bf16.mxu0 %v2705_v7 }
 0x2ca   :  { %680 = vmatpush1.bf16.msra.mxu1 %v2880_v9 }
 0x2cb   :  { %2216 = vmatprep.subr.bf16.mxu1 %v2565_v18  ;;  %755 = vmatpush1.bf16.msra.mxu0 %v2710_v8 }
 0x2cc   :  { %862 = vmatprep.subr.bf16.mxu0 %v2821_v63 }
 0x390   :  { %v588_v44 = vpop.f32.mrb[8].mxu1  ;;  %v629_v47 = vpop.f32.mrb[20].mxu0 }
 0x391   :  { %v589_v50 = vadd.f32 %v588_v44, %v2969_v43  ;;  %v630_v51 = vadd.f32 %v629_v47, %v2813_v46  ;;  %v590_v52 = vpop.f32.mrb[9].mxu1  ;;  %v2214_v54 = vpop.f32.mrb[21].mxu0 }
 0x392   :  { %v591_v55 = vadd.f32 %v590_v52, %v2794_v29  ;;  %v592_v56 = vpop.f32.mrb[10].mxu1  ;;  %v632_v58 = vpop.f32.mrb[22].mxu0 }
 0x393   :  { %v635_v59 = vadd.f32 %v589_v50, %v510_v48  ;;  %v593_v60 = vpop.f32.mrb[11].mxu1  ;;  %718 = vrot.lane.b32.xlu0 %v630_v51, %s2567_s7  ;;  %v2215_v26 = vpop.f32.mrb[23].mxu0 }
 0x394   :  { %716 = vrot.lane.b32.xlu1 %v591_v55, %s2567_s7 }
 0x395   :  { %v2105_v27 = vmul.f32 -1.442695, %v635_v59 }
 0x397   :  { %2352 = vpow2.f32 %v2105_v27  ;;  %652 = vrot.lane.b32.xlu0 %v2898_v37, %s2567_s7 }
 0x3a1   :  { %v2353_v62 = vpop.eup %2352 }
 0x3a2   :  { %v639_v11 = vadd.f32 1.0, %v2353_v62 }
 0x3a4   :  { %2354 = vrcp.f32 %v639_v11 }
 0x3ae   :  { %v2355_v15 = vpop.eup %2354 }
 0x3af   :  { %v642_v23 = vmul.f32 %v2355_v15, %v512_v14  ;;  %v645_v48 = vsub.f32 1.0, %v2355_v15 }
 0x3b1   :  { %v643_v24 = vadd.f32 %v642_v23, %v591_v55 }
 0x3b3   :  { %2356 = vtanh.f32 %v643_v24 }
 0x3bd   :  { %v2357_v31 = vpop.eup %2356 }
 0x3be   :  { %647 = vrot.lane.b32.xlu1 %v2357_v31, %s2567_s7 }
 0x405   :  { %v719_v34 = vpop.permute.xlu0 %718 }
 0x406   :  { %v717_v35 = vpop.permute.xlu1 %716 }
 0x407   :  { %v720_v36 = vsel %vm262_vm0, %v717_v35, %v719_v34 }
 0x408   :  { %v722_v37 = vadd.f32 %v720_v36, %v2807_v42 }
 0x409   :  { %v653_v47 = vpop.permute.xlu0 %652 }
 0x40a   :  { %v2107_v39 = vmul.f32 -1.442695, %v722_v37  ;;  %v655_v51 = vmul.f32 %v2355_v15, %v653_v47 }
 0x40c   :  { %2358 = vpow2.f32 %v2107_v39 }
 0x416   :  { %v2359_v40 = vpop.eup %2358 }
 0x417   :  { %v726_v25 = vadd.f32 1.0, %v2359_v40 }
 0x419   :  { %2360 = vrcp.f32 %v726_v25 }
 0x423   :  { %v2361_v41 = vpop.eup %2360 }
 0x424   :  { %v730_v38 = vmul.f32 %v2361_v41, %v719_v34  ;;  %v733_v56 = vsub.f32 1.0, %v2361_v41  ;;  %v739_v59 = vmul.f32 %v2361_v41, %v2913_v45 }
 0x426   :  { %v731_v44 = vadd.f32 %v730_v38, %v665_v30 }
 0x428   :  { %2362 = vtanh.f32 %v731_v44 }
 0x430   :  { %v648_v50 = vpop.permute.xlu1 %647 }
 0x431   :  { %v650_v52 = vmul.f32 %v648_v50, %v645_v48 }
 0x432   :  { %v2363_v54 = vpop.eup %2362 }
 0x433   :  { %v2986_v55 = vadd.f32 %v655_v51, %v650_v52  ;;  %735 = vrot.lane.b32.xlu1 %v2363_v54, %s2567_s7 }
 0x435   :  { %v666_v42 = vpack.c.bf16 %v2986_v55, %v2986_v55 }
 0x437   :  { %668 = vrot.lane.b32.xlu0 %v666_v42, %s2567_s7 }
 0x4a5   :  { %v736_v58 = vpop.permute.xlu1 %735 }
 0x4a6   :  { %v738_v60 = vmul.f32 %v736_v58, %v733_v56 }
 0x4a8   :  { %v2993_v26 = vadd.f32 %v739_v59, %v738_v60 }
 0x4a9   :  { %v669_v27 = vpop.permute.xlu0 %668 }
 0x4aa   :  { %2106 = vmatmul.mubr.msk.bf16.vlgmr.msra.gmra.mrb[12].mxu1 %vm262_vm0, %v669_v27  ;;  %v741_v62 = vpack.c.bf16 %v2993_v26, %v2993_v26 }
 0x4ab   :  { %2217 = vmatpush3.bf16.msra.mxu1 %v2740_v16  ;;  %2224 = vmatprep.mubr.msk.bf16.mxu1 %vm2566_vm2, %v2565_v18 }
 0x4ac   :  { %743 = vrot.lane.b32.xlu1 %v741_v62, %s2567_s7  ;;  %2218 = vmatprep.subr.bf16.mxu1 %v2565_v18 }
 0x4af   :  { %2219 = vmatpush3.bf16.msra.mxu1 %v2751_v20 }
 0x4b0   :  { %2220 = vmatprep.subr.bf16.mxu1 %v2565_v18 }
 0x4b3   :  { %2221 = vmatpush3.bf16.msra.mxu1 %v2762_v21 }
 0x4b4   :  { %2222 = vmatprep.subr.bf16.mxu1 %v2565_v18 }
 0x4b7   :  { %2223 = vmatpush3.bf16.msra.mxu1 %v2769_v22 }
 0x4b8   :  { %937 = vmatprep.subr.bf16.mxu1 %v2670_v1 }
 0x51e   :  { %v744_v45 = vpop.permute.xlu1 %743 }
 0x51f   :  { %2108 = vmatmul.mubr.msk.bf16.vlgmr.msra.gmra.mrb[24].mxu0 %vm262_vm0, %v744_v45  ;;  %2225 = vmatmul.mubr.msk.bf16.vlgmr.msra.gmra.mrb[16].mxu1 %vm262_vm0, %v744_v45 }
 0x520   :  { %863 = vmatpush1.bf16.msra.mxu0 %v2826_v10  ;;  %894 = vmatprep.mubr.bf16.mxu0 %v2564_v0 }
 0x521   :  { %864 = vmatprep.subr.bf16.mxu0 %v2837_v13  ;;  %938 = vmatpush1.bf16.msra.mxu1 %v2675_v2 }
 0x522   :  { %939 = vmatprep.subr.bf16.mxu1 %v2681_v3  ;;  %969 = vmatprep.mubr.bf16.mxu1 %v2564_v0 }
 0x524   :  { %865 = vmatpush1.bf16.msra.mxu0 %v2846_v17 }
 0x525   :  { %866 = vmatprep.subr.bf16.mxu0 %v2853_v19  ;;  %940 = vmatpush1.bf16.msra.mxu1 %v2687_v4 }
 0x526   :  { %941 = vmatprep.subr.bf16.mxu1 %v2693_v5 }
 0x528   :  { %867 = vmatpush1.bf16.msra.mxu0 %v2868_v28 }
 0x529   :  { %868 = vmatprep.subr.bf16.mxu0 %v2874_v33  ;;  %942 = vmatpush1.bf16.msra.mxu1 %v2699_v6 }
 0x52a   :  { %943 = vmatprep.subr.bf16.mxu1 %v2705_v7 }
 0x52c   :  { %869 = vmatpush1.bf16.msra.mxu0 %v2880_v9 }
 0x52d   :  { %2228 = vmatprep.subr.bf16.mxu0 %v2565_v18  ;;  %944 = vmatpush1.bf16.msra.mxu1 %v2710_v8 }
 0x52e   :  { %1051 = vmatprep.subr.bf16.mxu1 %v2821_v63 }
 0x57d   :  { %v707_v11 = vpop.f32.mrb[12].mxu1 }
 0x57e   :  { %v709_v14 = vpop.f32.mrb[13].mxu1  ;;  %v708_v34 = vadd.f32 %v707_v11, %v2965_v32 }
 0x57f   :  { %v711_v15 = vpop.f32.mrb[14].mxu1  ;;  %v710_v51 = vadd.f32 %v709_v14, %v2980_v12 }
 0x580   :  { %v712_v23 = vpop.f32.mrb[15].mxu1 }
 0x581   :  { %v854_v23 = vld [vmem:[#allocation2 + $0x28] sm:$0xff] }
 0x5f2   :  { %v782_v24 = vpop.f32.mrb[24].mxu0  ;;  %v823_v31 = vpop.f32.mrb[16].mxu1 }
 0x5f3   :  { %v783_v35 = vadd.f32 %v782_v24, %v2969_v43  ;;  %v824_v36 = vadd.f32 %v823_v31, %v2813_v46  ;;  %v784_v37 = vpop.f32.mrb[25].mxu0  ;;  %v2226_v39 = vpop.f32.mrb[17].mxu1 }
 0x5f4   :  { %v785_v40 = vadd.f32 %v784_v37, %v2794_v29  ;;  %v786_v25 = vpop.f32.mrb[26].mxu0  ;;  %v826_v41 = vpop.f32.mrb[18].mxu1 }
 0x5f5   :  { %v829_v38 = vadd.f32 %v783_v35, %v708_v34  ;;  %907 = vrot.lane.b32.xlu1 %v824_v36, %s2567_s7  ;;  %v787_v30 = vpop.f32.mrb[27].mxu0  ;;  %v2227_v44 = vpop.f32.mrb[19].mxu1 }
 0x5f6   :  { %905 = vrot.lane.b32.xlu0 %v785_v40, %s2567_s7 }
 0x5f7   :  { %v2110_v47 = vmul.f32 -1.442695, %v829_v38 }
 0x5f9   :  { %2364 = vpow2.f32 %v2110_v47 }
 0x603   :  { %v2365_v48 = vpop.eup %2364 }
 0x604   :  { %v833_v50 = vadd.f32 1.0, %v2365_v48 }
 0x606   :  { %2366 = vrcp.f32 %v833_v50 }
 0x610   :  { %v2367_v52 = vpop.eup %2366 }
 0x611   :  { %v836_v54 = vmul.f32 %v2367_v52, %v710_v51  ;;  %v839_v31 = vsub.f32 1.0, %v2367_v52  ;;  %v845_v35 = vmul.f32 %v2367_v52, %v2986_v55 }
 0x613   :  { %v837_v42 = vadd.f32 %v836_v54, %v785_v40 }
 0x615   :  { %2368 = vtanh.f32 %v837_v42 }
 0x61f   :  { %v2369_v56 = vpop.eup %2368 }
 0x620   :  { %841 = vrot.lane.b32.xlu0 %v2369_v56, %s2567_s7 }
 0x667   :  { %v908_v58 = vpop.permute.xlu1 %907 }
 0x668   :  { %v906_v59 = vpop.permute.xlu0 %905 }
 0x669   :  { %v909_v60 = vsel %vm262_vm0, %v906_v59, %v908_v58 }
 0x66a   :  { %v911_v27 = vadd.f32 %v909_v60, %v2919_v49 }
 0x66c   :  { %v2112_v62 = vmul.f32 -1.442695, %v911_v27 }
 0x66e   :  { %2370 = vpow2.f32 %v2112_v62 }
 0x678   :  { %v2371_v45 = vpop.eup %2370 }
 0x679   :  { %v915_v11 = vadd.f32 1.0, %v2371_v45 }
 0x67b   :  { %2372 = vrcp.f32 %v915_v11 }
 0x685   :  { %v2373_v15 = vpop.eup %2372 }
 0x686   :  { %v919_v14 = vmul.f32 %v2373_v15, %v908_v58  ;;  %v922_v40 = vsub.f32 1.0, %v2373_v15  ;;  %v928_v41 = vmul.f32 %v2373_v15, %v2993_v26 }
 0x688   :  { %v920_v24 = vadd.f32 %v919_v14, %v854_v23 }
 0x68a   :  { %2374 = vtanh.f32 %v920_v24 }
 0x692   :  { %v842_v34 = vpop.permute.xlu0 %841 }
 0x693   :  { %v844_v36 = vmul.f32 %v842_v34, %v839_v31 }
 0x694   :  { %v2375_v37 = vpop.eup %2374 }
 0x695   :  { %v3040_v39 = vadd.f32 %v845_v35, %v844_v36  ;;  %924 = vrot.lane.b32.xlu1 %v2375_v37, %s2567_s7 }
 0x697   :  { %v855_v49 = vpack.c.bf16 %v3040_v39, %v3040_v39 }
 0x699   :  { %857 = vrot.lane.b32.xlu0 %v855_v49, %s2567_s7 }
 0x707   :  { %v925_v25 = vpop.permute.xlu1 %924 }
 0x708   :  { %v927_v38 = vmul.f32 %v925_v25, %v922_v40 }
 0x70a   :  { %v3047_v30 = vadd.f32 %v928_v41, %v927_v38  ;;  %v1043_v41 = vld [vmem:[#allocation2 + $0x38] sm:$0xff] }
 0x70b   :  { %v858_v44 = vpop.permute.xlu0 %857 }
 0x70c   :  { %2111 = vmatmul.mubr.msk.bf16.vlgmr.msra.gmra.mrb[28].mxu0 %vm262_vm0, %v858_v44  ;;  %v930_v47 = vpack.c.bf16 %v3047_v30, %v3047_v30 }
 0x70d   :  { %2229 = vmatpush3.bf16.msra.mxu0 %v2740_v16  ;;  %2236 = vmatprep.mubr.msk.bf16.mxu0 %vm2566_vm2, %v2565_v18 }
 0x70e   :  { %932 = vrot.lane.b32.xlu1 %v930_v47, %s2567_s7  ;;  %2230 = vmatprep.subr.bf16.mxu0 %v2565_v18 }
 0x711   :  { %2231 = vmatpush3.bf16.msra.mxu0 %v2751_v20 }
 0x712   :  { %2232 = vmatprep.subr.bf16.mxu0 %v2565_v18 }
 0x715   :  { %2233 = vmatpush3.bf16.msra.mxu0 %v2762_v21 }
 0x716   :  { %2234 = vmatprep.subr.bf16.mxu0 %v2565_v18 }
 0x719   :  { %2235 = vmatpush3.bf16.msra.mxu0 %v2769_v22 }
 0x71a   :  { %1126 = vmatprep.subr.bf16.mxu0 %v2670_v1 }
 0x780   :  { %v933_v26 = vpop.permute.xlu1 %932 }
 0x781   :  { %2113 = vmatmul.mubr.msk.bf16.vlgmr.msra.gmra.mrb[20].mxu1 %vm262_vm0, %v933_v26  ;;  %2237 = vmatmul.mubr.msk.bf16.vlgmr.msra.gmra.mrb[32].mxu0 %vm262_vm0, %v933_v26 }
 0x782   :  { %1052 = vmatpush1.bf16.msra.mxu1 %v2826_v10  ;;  %1083 = vmatprep.mubr.bf16.mxu1 %v2564_v0 }
 0x783   :  { %1053 = vmatprep.subr.bf16.mxu1 %v2837_v13  ;;  %1127 = vmatpush1.bf16.msra.mxu0 %v2675_v2 }
 0x784   :  { %1128 = vmatprep.subr.bf16.mxu0 %v2681_v3  ;;  %1158 = vmatprep.mubr.bf16.mxu0 %v2564_v0 }
 0x786   :  { %1054 = vmatpush1.bf16.msra.mxu1 %v2846_v17 }
 0x787   :  { %1055 = vmatprep.subr.bf16.mxu1 %v2853_v19  ;;  %1129 = vmatpush1.bf16.msra.mxu0 %v2687_v4 }
 0x788   :  { %1130 = vmatprep.subr.bf16.mxu0 %v2693_v5 }
 0x78a   :  { %1056 = vmatpush1.bf16.msra.mxu1 %v2868_v28 }
 0x78b   :  { %1057 = vmatprep.subr.bf16.mxu1 %v2874_v33  ;;  %1131 = vmatpush1.bf16.msra.mxu0 %v2699_v6 }
 0x78c   :  { %1132 = vmatprep.subr.bf16.mxu0 %v2705_v7 }
 0x78e   :  { %1058 = vmatpush1.bf16.msra.mxu1 %v2880_v9 }
 0x78f   :  { %2240 = vmatprep.subr.bf16.mxu1 %v2565_v18  ;;  %1133 = vmatpush1.bf16.msra.mxu0 %v2710_v8 }
 0x790   :  { %1240 = vmatprep.subr.bf16.mxu0 %v2821_v63 }
 0x7df   :  { %v896_v1 = vpop.f32.mrb[28].mxu0 }
 0x7e0   :  { %v898_v2 = vpop.f32.mrb[29].mxu0  ;;  %v897_v50 = vadd.f32 %v896_v1, %v2965_v32 }
 0x7e1   :  { %v900_v3 = vpop.f32.mrb[30].mxu0  ;;  %v899_v45 = vadd.f32 %v898_v2, %v2980_v12 }
 0x7e2   :  { %v901_v4 = vpop.f32.mrb[31].mxu0 }
 0x854   :  { %v971_v5 = vpop.f32.mrb[20].mxu1  ;;  %v1012_v48 = vpop.f32.mrb[32].mxu0 }
 0x855   :  { %v972_v6 = vadd.f32 %v971_v5, %v2969_v43  ;;  %v1013_v7 = vadd.f32 %v1012_v48, %v2813_v46  ;;  %v973_v51 = vpop.f32.mrb[21].mxu1  ;;  %v2238_v52 = vpop.f32.mrb[33].mxu0 }
 0x856   :  { %v974_v54 = vadd.f32 %v973_v51, %v2794_v29  ;;  %v975_v42 = vpop.f32.mrb[22].mxu1  ;;  %v1015_v8 = vpop.f32.mrb[34].mxu0  ;;  %v3151_v52 = vld [vmem:[%s3496_s6 + $0x34] ss:$12 sps:$4 sm:$0xff]  }
 0x857   :  { %v1018_v56 = vadd.f32 %v972_v6, %v897_v50  ;;  %v976_v58 = vpop.f32.mrb[23].mxu1  ;;  %1096 = vrot.lane.b32.xlu1 %v1013_v7, %s2567_s7  ;;  %v2239_v59 = vpop.f32.mrb[35].mxu0  ;;  %v3165_v42 = vld [vmem:[%s3496_s6 + $0x4c] ss:$12 sps:$4 sm:$0xff]   ;;  %v3173_v8 = vld [vmem:[%s3496_s6 + $0x48] ss:$12 sps:$4 sm:$0xff]  }
 0x858   :  { %1094 = vrot.lane.b32.xlu0 %v974_v54, %s2567_s7 }
 0x859   :  { %v2115_v60 = vmul.f32 -1.442695, %v1018_v56 }
 0x85b   :  { %2376 = vpow2.f32 %v2115_v60 }
 0x865   :  { %v2377_v27 = vpop.eup %2376 }
 0x866   :  { %v1022_v62 = vadd.f32 1.0, %v2377_v27 }
 0x868   :  { %2378 = vrcp.f32 %v1022_v62 }
 0x872   :  { %v2379_v11 = vpop.eup %2378 }
 0x873   :  { %v1025_v15 = vmul.f32 %v2379_v11, %v899_v45  ;;  %v1028_v44 = vsub.f32 1.0, %v2379_v11  ;;  %v1034_v26 = vmul.f32 %v2379_v11, %v3040_v39 }
 0x875   :  { %v1026_v14 = vadd.f32 %v1025_v15, %v974_v54  ;;  %v3159_v54 = vld [vmem:[%s3496_s6 + $0x30] ss:$12 sps:$4 sm:$0xff]  }
 0x877   :  { %2380 = vtanh.f32 %v1026_v14 }
 0x881   :  { %v2381_v23 = vpop.eup %2380 }
 0x882   :  { %1030 = vrot.lane.b32.xlu0 %v2381_v23, %s2567_s7 }
 0x8c9   :  { %v1097_v24 = vpop.permute.xlu1 %1096 }
 0x8ca   :  { %v1095_v31 = vpop.permute.xlu0 %1094 }
 0x8cb   :  { %v1098_v34 = vsel %vm262_vm0, %v1095_v31, %v1097_v24 }
 0x8cc   :  { %v1100_v35 = vadd.f32 %v1098_v34, %v2923_v53 }
 0x8ce   :  { %v2117_v36 = vmul.f32 -1.442695, %v1100_v35 }
 0x8d0   :  { %2382 = vpow2.f32 %v2117_v36 }
 0x8da   :  { %v2383_v37 = vpop.eup %2382 }
 0x8db   :  { %v1104_v49 = vadd.f32 1.0, %v2383_v37 }
 0x8dd   :  { %2384 = vrcp.f32 %v1104_v49 }
 0x8e7   :  { %v2385_v40 = vpop.eup %2384 }
 0x8e8   :  { %v1108_v25 = vmul.f32 %v2385_v40, %v1097_v24  ;;  %v1111_v4 = vsub.f32 1.0, %v2385_v40  ;;  %v1117_v48 = vmul.f32 %v2385_v40, %v3047_v30 }
 0x8ea   :  { %v1109_v38 = vadd.f32 %v1108_v25, %v1043_v41 }
 0x8ec   :  { %2386 = vtanh.f32 %v1109_v38 }
 0x8f4   :  { %v1031_v47 = vpop.permute.xlu0 %1030 }
 0x8f5   :  { %v1033_v1 = vmul.f32 %v1031_v47, %v1028_v44 }
 0x8f6   :  { %v2387_v2 = vpop.eup %2386 }
 0x8f7   :  { %v3094_v3 = vadd.f32 %v1034_v26, %v1033_v1  ;;  %1113 = vrot.lane.b32.xlu1 %v2387_v2, %s2567_s7 }
 0x8f9   :  { %v1044_v53 = vpack.c.bf16 %v3094_v3, %v3094_v3 }
 0x8fb   :  { %1046 = vrot.lane.b32.xlu0 %v1044_v53, %s2567_s7 }
 0x969   :  { %v1114_v5 = vpop.permute.xlu1 %1113 }
 0x96a   :  { %v1116_v50 = vmul.f32 %v1114_v5, %v1111_v4 }
 0x96c   :  { %v3101_v6 = vadd.f32 %v1117_v48, %v1116_v50 }
 0x96d   :  { %v1047_v7 = vpop.permute.xlu0 %1046 }
 0x96e   :  { %2116 = vmatmul.mubr.msk.bf16.vlgmr.msra.gmra.mrb[24].mxu1 %vm262_vm0, %v1047_v7  ;;  %v1119_v51 = vpack.c.bf16 %v3101_v6, %v3101_v6 }
 0x96f   :  { %2241 = vmatpush3.bf16.msra.mxu1 %v2740_v16  ;;  %2248 = vmatprep.mubr.msk.bf16.mxu1 %vm2566_vm2, %v2565_v18  ;;  %v3119_v16 = vld [vmem:[%s3496_s6 + $0x4] ss:$12 sps:$4 sm:$0xff]  }
 0x970   :  { %1121 = vrot.lane.b32.xlu1 %v1119_v51, %s2567_s7  ;;  %2242 = vmatprep.subr.bf16.mxu1 %v2565_v18 }
 0x973   :  { %2243 = vmatpush3.bf16.msra.mxu1 %v2751_v20  ;;  %v3130_v20 = vld [vmem:[%s3496_s6] ss:$12 sps:$4 sm:$0xff]  }
 0x974   :  { %2244 = vmatprep.subr.bf16.mxu1 %v2565_v18 }
 0x977   :  { %2245 = vmatpush3.bf16.msra.mxu1 %v2762_v21  ;;  %v3136_v21 = vld [vmem:[%s3496_s6 + $0x1c] ss:$12 sps:$4 sm:$0xff]  }
 0x978   :  { %2246 = vmatprep.subr.bf16.mxu1 %v2565_v18 }
 0x97b   :  { %2247 = vmatpush3.bf16.msra.mxu1 %v2769_v22  ;;  %v3145_v22 = vld [vmem:[%s3496_s6 + $0x18] ss:$12 sps:$4 sm:$0xff]  }
 0x97c   :  { %1315 = vmatprep.subr.bf16.mxu1 %v3119_v16 }
 0x9e2   :  { %v1122_v30 = vpop.permute.xlu1 %1121 }
 0x9e3   :  { %2118 = vmatmul.mubr.msk.bf16.vlgmr.msra.gmra.mrb[36].mxu0 %vm262_vm0, %v1122_v30  ;;  %2249 = vmatmul.mubr.msk.bf16.vlgmr.msra.gmra.mrb[28].mxu1 %vm262_vm0, %v1122_v30  ;;  %v1232_v30 = vld [vmem:[#allocation2 + $0x48] sm:$0xff] }
 0x9e4   :  { %1241 = vmatpush1.bf16.msra.mxu0 %v2826_v10  ;;  %1272 = vmatprep.mubr.bf16.mxu0 %v2564_v0 }
 0x9e5   :  { %1242 = vmatprep.subr.bf16.mxu0 %v2837_v13  ;;  %1316 = vmatpush1.bf16.msra.mxu1 %v3130_v20 }
 0x9e6   :  { %1317 = vmatprep.subr.bf16.mxu1 %v3136_v21  ;;  %1347 = vmatprep.mubr.bf16.mxu1 %v2564_v0 }
 0x9e8   :  { %1243 = vmatpush1.bf16.msra.mxu0 %v2846_v17 }
 0x9e9   :  { %1244 = vmatprep.subr.bf16.mxu0 %v2853_v19  ;;  %1318 = vmatpush1.bf16.msra.mxu1 %v3145_v22 }
 0x9ea   :  { %1319 = vmatprep.subr.bf16.mxu1 %v3151_v52 }
 0x9ec   :  { %1245 = vmatpush1.bf16.msra.mxu0 %v2868_v28 }
 0x9ed   :  { %1246 = vmatprep.subr.bf16.mxu0 %v2874_v33  ;;  %1320 = vmatpush1.bf16.msra.mxu1 %v3159_v54 }
 0x9ee   :  { %1321 = vmatprep.subr.bf16.mxu1 %v3165_v42 }
 0x9f0   :  { %1247 = vmatpush1.bf16.msra.mxu0 %v2880_v9 }
 0x9f1   :  { %2252 = vmatprep.subr.bf16.mxu0 %v2565_v18  ;;  %1322 = vmatpush1.bf16.msra.mxu1 %v3173_v8 }
 0x9f2   :  { %1429 = vmatprep.subr.bf16.mxu1 %v2821_v63 }
 0xa41   :  { %v1085_v56 = vpop.f32.mrb[24].mxu1 }
 0xa42   :  { %v1087_v58 = vpop.f32.mrb[25].mxu1  ;;  %v1086_v45 = vadd.f32 %v1085_v56, %v2965_v32 }
 0xa43   :  { %v1089_v59 = vpop.f32.mrb[26].mxu1  ;;  %v1088_v41 = vadd.f32 %v1087_v58, %v2980_v12 }
 0xa44   :  { %v1090_v60 = vpop.f32.mrb[27].mxu1 }
 0xab6   :  { %v1160_v27 = vpop.f32.mrb[36].mxu0  ;;  %v1201_v62 = vpop.f32.mrb[28].mxu1 }
 0xab7   :  { %v1161_v11 = vadd.f32 %v1160_v27, %v2969_v43  ;;  %v1202_v15 = vadd.f32 %v1201_v62, %v2813_v46  ;;  %v1162_v14 = vpop.f32.mrb[37].mxu0  ;;  %v2250_v23 = vpop.f32.mrb[29].mxu1 }
 0xab8   :  { %v1163_v24 = vadd.f32 %v1162_v14, %v2794_v29  ;;  %v1164_v31 = vpop.f32.mrb[38].mxu0  ;;  %v1204_v34 = vpop.f32.mrb[30].mxu1 }
 0xab9   :  { %v1207_v35 = vadd.f32 %v1161_v11, %v1086_v45  ;;  %v1165_v36 = vpop.f32.mrb[39].mxu0  ;;  %1285 = vrot.lane.b32.xlu1 %v1202_v15, %s2567_s7  ;;  %v2251_v37 = vpop.f32.mrb[31].mxu1 }
 0xaba   :  { %1283 = vrot.lane.b32.xlu0 %v1163_v24, %s2567_s7  ;;  %v3220_v36 = vld [vmem:[%s3496_s6 + $0x38] ss:$12 sps:$4 sm:$0xff]   ;;  %v3227_v37 = vld [vmem:[%s3496_s6 + $0x50] ss:$12 sps:$4 sm:$0xff]  }
 0xabb   :  { %v2120_v49 = vmul.f32 -1.442695, %v1207_v35  ;;  %v3203_v35 = vld [vmem:[%s3496_s6 + $0x8] ss:$12 sps:$4 sm:$0xff]  }
 0xabd   :  { %2388 = vpow2.f32 %v2120_v49 }
 0xac7   :  { %v2389_v40 = vpop.eup %2388 }
 0xac8   :  { %v1211_v25 = vadd.f32 1.0, %v2389_v40 }
 0xaca   :  { %2390 = vrcp.f32 %v1211_v25 }
 0xad4   :  { %v2391_v38 = vpop.eup %2390 }
 0xad5   :  { %v1214_v44 = vmul.f32 %v2391_v38, %v1088_v41  ;;  %v1217_v58 = vsub.f32 1.0, %v2391_v38  ;;  %v1223_v60 = vmul.f32 %v2391_v38, %v3094_v3 }
 0xad7   :  { %v1215_v47 = vadd.f32 %v1214_v44, %v1163_v24 }
 0xad9   :  { %2392 = vtanh.f32 %v1215_v47 }
 0xae3   :  { %v2393_v26 = vpop.eup %2392 }
 0xae4   :  { %1219 = vrot.lane.b32.xlu0 %v2393_v26, %s2567_s7 }
 0xb2b   :  { %v1286_v1 = vpop.permute.xlu1 %1285 }
 0xb2c   :  { %v1284_v2 = vpop.permute.xlu0 %1283 }
 0xb2d   :  { %v1287_v53 = vsel %vm262_vm0, %v1284_v2, %v1286_v1 }
 0xb2e   :  { %v1289_v4 = vadd.f32 %v1287_v53, %v2929_v57 }
 0xb30   :  { %v2122_v5 = vmul.f32 -1.442695, %v1289_v4 }
 0xb32   :  { %2394 = vpow2.f32 %v2122_v5 }
 0xb3c   :  { %v2395_v48 = vpop.eup %2394 }
 0xb3d   :  { %v1293_v50 = vadd.f32 1.0, %v2395_v48 }
 0xb3f   :  { %2396 = vrcp.f32 %v1293_v50 }
 0xb49   :  { %v2397_v7 = vpop.eup %2396 }
 0xb4a   :  { %v1297_v51 = vmul.f32 %v2397_v7, %v1286_v1  ;;  %v1300_v11 = vsub.f32 1.0, %v2397_v7  ;;  %v1306_v14 = vmul.f32 %v2397_v7, %v3101_v6  ;;  %v3213_v6 = vld [vmem:[%s3496_s6 + $0x20] ss:$12 sps:$4 sm:$0xff]   ;;  %s2568_s6 = smov [#allocation10]  }
 0xb4b   :  { %s2056_s15 = sshll.u32 %s2568_s6, 4  ;;  %s2057_s15 = int_to_ptr.vmem [resolvable:$true] %s2056_s15 }
 0xb4c   :  { %v1298_v56 = vadd.f32 %v1297_v51, %v1232_v30  ;;  %s2533_s0 = scalar_lea.vmem %s2057_s15, 128  ;;  %p2538_p11 = scmp.lt.s32.totalorder %s2057_s15, %s2057_s15 }
 0xb4d   :  { %p2534_p10 = scmp.ne.s32.totalorder %s2057_s15, %s2533_s0  ;;  %p2539_p12 = scmp.lt.s32.totalorder %s2533_s0, %s2533_s0 }
 0xb4e   :  { %2398 = vtanh.f32 %v1298_v56 }
 0xb4f   :  { %p2540_p13 = por %p2539_p12, %p2538_p11 }
 0xb51   :  { %p2541_p0 = pnand %p2540_p13, %p2534_p10 }
 0xb56   :  { %v1220_v59 = vpop.permute.xlu0 %1219 }
 0xb57   :  { %v1222_v27 = vmul.f32 %v1220_v59, %v1217_v58 }
 0xb58   :  { %v2399_v62 = vpop.eup %2398 }
 0xb59   :  { %v3188_v45 = vadd.f32 %v1223_v60, %v1222_v27  ;;  %1302 = vrot.lane.b32.xlu1 %v2399_v62, %s2567_s7 }
 0xb5b   :  { %v1233_v57 = vpack.c.bf16 %v3188_v45, %v3188_v45 }
 0xb5d   :  { %1235 = vrot.lane.b32.xlu0 %v1233_v57, %s2567_s7 }
 0xbcb   :  { %v1303_v15 = vpop.permute.xlu1 %1302 }
 0xbcc   :  { %v1305_v23 = vmul.f32 %v1303_v15, %v1300_v11 }
 0xbce   :  { %v3195_v24 = vadd.f32 %v1306_v14, %v1305_v23  ;;  %v1421_v14 = vld [vmem:[#allocation2 + $0x58] sm:$0xff] }
 0xbcf   :  { %v1236_v31 = vpop.permute.xlu0 %1235 }
 0xbd0   :  { %2121 = vmatmul.mubr.msk.bf16.vlgmr.msra.gmra.mrb[40].mxu0 %vm262_vm0, %v1236_v31  ;;  %v1308_v34 = vpack.c.bf16 %v3195_v24, %v3195_v24 }
 0xbd1   :  { %2253 = vmatpush3.bf16.msra.mxu0 %v3203_v35  ;;  %2260 = vmatprep.mubr.msk.bf16.mxu0 %vm2566_vm2, %v2565_v18 }
 0xbd2   :  { %1310 = vrot.lane.b32.xlu1 %v1308_v34, %s2567_s7  ;;  %2254 = vmatprep.subr.bf16.mxu0 %v2565_v18 }
 0xbd5   :  { %2255 = vmatpush3.bf16.msra.mxu0 %v3213_v6 }
 0xbd6   :  { %2256 = vmatprep.subr.bf16.mxu0 %v2565_v18 }
 0xbd9   :  { %2257 = vmatpush3.bf16.msra.mxu0 %v3220_v36 }
 0xbda   :  { %2258 = vmatprep.subr.bf16.mxu0 %v2565_v18 }
 0xbdd   :  { %2259 = vmatpush3.bf16.msra.mxu0 %v3227_v37 }
 0xbde   :  { %1504 = vmatprep.subr.bf16.mxu0 %v3119_v16 }
 0xc44   :  { %v1311_v49 = vpop.permute.xlu1 %1310 }
 0xc45   :  { %2123 = vmatmul.mubr.msk.bf16.vlgmr.msra.gmra.mrb[32].mxu1 %vm262_vm0, %v1311_v49  ;;  %2261 = vmatmul.mubr.msk.bf16.vlgmr.msra.gmra.mrb[44].mxu0 %vm262_vm0, %v1311_v49 }
 0xc46   :  { %1430 = vmatpush1.bf16.msra.mxu1 %v2826_v10  ;;  %1461 = vmatprep.mubr.bf16.mxu1 %v2564_v0 }
 0xc47   :  { %1431 = vmatprep.subr.bf16.mxu1 %v2837_v13  ;;  %1505 = vmatpush1.bf16.msra.mxu0 %v3130_v20 }
 0xc48   :  { %1506 = vmatprep.subr.bf16.mxu0 %v3136_v21  ;;  %1536 = vmatprep.mubr.bf16.mxu0 %v2564_v0 }
 0xc4a   :  { %1432 = vmatpush1.bf16.msra.mxu1 %v2846_v17 }
 0xc4b   :  { %1433 = vmatprep.subr.bf16.mxu1 %v2853_v19  ;;  %1507 = vmatpush1.bf16.msra.mxu0 %v3145_v22 }
 0xc4c   :  { %1508 = vmatprep.subr.bf16.mxu0 %v3151_v52 }
 0xc4e   :  { %1434 = vmatpush1.bf16.msra.mxu1 %v2868_v28 }
 0xc4f   :  { %1435 = vmatprep.subr.bf16.mxu1 %v2874_v33  ;;  %1509 = vmatpush1.bf16.msra.mxu0 %v3159_v54 }
 0xc50   :  { %1510 = vmatprep.subr.bf16.mxu0 %v3165_v42 }
 0xc52   :  { %1436 = vmatpush1.bf16.msra.mxu1 %v2880_v9 }
 0xc53   :  { %2264 = vmatprep.subr.bf16.mxu1 %v2565_v18  ;;  %1511 = vmatpush1.bf16.msra.mxu0 %v3173_v8 }
 0xc54   :  { %1618 = vmatprep.subr.bf16.mxu0 %v2821_v63 }
 0xca3   :  { %v1274_v10 = vpop.f32.mrb[40].mxu0 }
 0xca4   :  { %v1276_v13 = vpop.f32.mrb[41].mxu0  ;;  %v1275_v33 = vadd.f32 %v1274_v10, %v2965_v32 }
 0xca5   :  { %v1278_v17 = vpop.f32.mrb[42].mxu0  ;;  %v1277_v48 = vadd.f32 %v1276_v13, %v2980_v12 }
 0xca6   :  { %v1279_v19 = vpop.f32.mrb[43].mxu0 }
 0xd18   :  { %v1349_v40 = vpop.f32.mrb[32].mxu1  ;;  %v1390_v28 = vpop.f32.mrb[44].mxu0 }
 0xd19   :  { %v1350_v25 = vadd.f32 %v1349_v40, %v2969_v43  ;;  %v1391_v41 = vadd.f32 %v1390_v28, %v2813_v46  ;;  %v1351_v38 = vpop.f32.mrb[33].mxu1  ;;  %v2262_v9 = vpop.f32.mrb[45].mxu0 }
 0xd1a   :  { %v1352_v44 = vadd.f32 %v1351_v38, %v2794_v29  ;;  %v1353_v47 = vpop.f32.mrb[34].mxu1  ;;  %v1393_v26 = vpop.f32.mrb[46].mxu0  ;;  %v3290_v9 = vld [vmem:[%s3494_s4] ss:$8 sps:$4 sm:$0xff]  }
 0xd1b   :  { %v1396_v1 = vadd.f32 %v1350_v25, %v1275_v33  ;;  %v1354_v63 = vpop.f32.mrb[35].mxu1  ;;  %1474 = vrot.lane.b32.xlu1 %v1391_v41, %s2567_s7  ;;  %v2263_v2 = vpop.f32.mrb[47].mxu0  ;;  %v3306_v47 = vld [vmem:[%s3494_s4 + $0x10] ss:$8 sps:$4 sm:$0xff]   ;;  %v3312_v26 = vld [vmem:[%s3494_s4 + $0x24] ss:$8 sps:$4 sm:$0xff]  }
 0xd1c   :  { %1472 = vrot.lane.b32.xlu0 %v1352_v44, %s2567_s7  ;;  %v3326_v63 = vld [vmem:[%s3494_s4 + $0x34] ss:$8 sps:$4 sm:$0xff]   ;;  %v3334_v2 = vld [vmem:[%s3494_s4 + $0x30] ss:$8 sps:$4 sm:$0xff]  }
 0xd1d   :  { %v2125_v53 = vmul.f32 -1.442695, %v1396_v1  ;;  %v3320_v1 = vld [vmem:[%s3494_s4 + $0x20] ss:$8 sps:$4 sm:$0xff]  }
 0xd1f   :  { %2400 = vpow2.f32 %v2125_v53  ;;  %v2465_v53 = vld [vmem:[%s3494_s4 + $0x4] ss:$8 sps:$4 sm:$0xff]  }
 0xd29   :  { %v2401_v4 = vpop.eup %2400 }
 0xd2a   :  { %v1400_v5 = vadd.f32 1.0, %v2401_v4 }
 0xd2c   :  { %2402 = vrcp.f32 %v1400_v5 }
 0xd36   :  { %v2403_v50 = vpop.eup %2402 }
 0xd37   :  { %v1403_v7 = vmul.f32 %v2403_v50, %v1277_v48  ;;  %v1406_v31 = vsub.f32 1.0, %v2403_v50  ;;  %v1412_v49 = vmul.f32 %v2403_v50, %v3188_v45 }
 0xd39   :  { %v1404_v51 = vadd.f32 %v1403_v7, %v1352_v44  ;;  %v3297_v44 = vld [vmem:[%s3494_s4 + $0x14] ss:$8 sps:$4 sm:$0xff]  }
 0xd3b   :  { %2404 = vtanh.f32 %v1404_v51 }
 0xd45   :  { %v2405_v30 = vpop.eup %2404 }
 0xd46   :  { %1408 = vrot.lane.b32.xlu0 %v2405_v30, %s2567_s7 }
 0xd8d   :  { %v1475_v56 = vpop.permute.xlu1 %1474 }
 0xd8e   :  { %v1473_v58 = vpop.permute.xlu0 %1472 }
 0xd8f   :  { %v1476_v59 = vsel %vm262_vm0, %v1473_v58, %v1475_v56 }
 0xd90   :  { %v1478_v60 = vadd.f32 %v1476_v59, %v2933_v61 }
 0xd92   :  { %v2127_v27 = vmul.f32 -1.442695, %v1478_v60 }
 0xd94   :  { %2406 = vpow2.f32 %v2127_v27 }
 0xd9e   :  { %v2407_v62 = vpop.eup %2406 }
 0xd9f   :  { %v1482_v57 = vadd.f32 1.0, %v2407_v62 }
 0xda1   :  { %2408 = vrcp.f32 %v1482_v57 }
 0xdab   :  { %v2409_v11 = vpop.eup %2408 }
 0xdac   :  { %v1486_v15 = vmul.f32 %v2409_v11, %v1475_v56  ;;  %v1489_v19 = vsub.f32 1.0, %v2409_v11  ;;  %v1495_v28 = vmul.f32 %v2409_v11, %v3195_v24 }
 0xdae   :  { %v1487_v23 = vadd.f32 %v1486_v15, %v1421_v14 }
 0xdb0   :  { %2410 = vtanh.f32 %v1487_v23 }
 0xdb8   :  { %v1409_v34 = vpop.permute.xlu0 %1408 }
 0xdb9   :  { %v1411_v10 = vmul.f32 %v1409_v34, %v1406_v31 }
 0xdba   :  { %v2411_v13 = vpop.eup %2410 }
 0xdbb   :  { %v3262_v17 = vadd.f32 %v1412_v49, %v1411_v10  ;;  %1491 = vrot.lane.b32.xlu1 %v2411_v13, %s2567_s7 }
 0xdbd   :  { %v1422_v61 = vpack.c.bf16 %v3262_v17, %v3262_v17 }
 0xdbf   :  { %1424 = vrot.lane.b32.xlu0 %v1422_v61, %s2567_s7 }
 0xe2d   :  { %v1492_v40 = vpop.permute.xlu1 %1491 }
 0xe2e   :  { %v1494_v33 = vmul.f32 %v1492_v40, %v1489_v19 }
 0xe30   :  { %v3269_v25 = vadd.f32 %v1495_v28, %v1494_v33 }
 0xe31   :  { %v1425_v41 = vpop.permute.xlu0 %1424 }
 0xe32   :  { %2126 = vmatmul.mubr.msk.bf16.vlgmr.msra.gmra.mrb[36].mxu1 %vm262_vm0, %v1425_v41  ;;  %v1497_v38 = vpack.c.bf16 %v3269_v25, %v3269_v25  ;;  %v2466_v41 = vld [vmem:[#allocation2 + $0x60] sm:$0xff] }
 0xe33   :  { %2265 = vmatpush3.bf16.msra.mxu1 %v3203_v35  ;;  %2272 = vmatprep.mubr.msk.bf16.mxu1 %vm2566_vm2, %v2565_v18 }
 0xe34   :  { %1499 = vrot.lane.b32.xlu1 %v1497_v38, %s2567_s7  ;;  %2266 = vmatprep.subr.bf16.mxu1 %v2565_v18 }
 0xe37   :  { %2267 = vmatpush3.bf16.msra.mxu1 %v3213_v6 }
 0xe38   :  { %2268 = vmatprep.subr.bf16.mxu1 %v2565_v18 }
 0xe3b   :  { %2269 = vmatpush3.bf16.msra.mxu1 %v3220_v36 }
 0xe3c   :  { %2270 = vmatprep.subr.bf16.mxu1 %v2565_v18 }
 0xe3f   :  { %2271 = vmatpush3.bf16.msra.mxu1 %v3227_v37 }
 0xe40   :  { %1693 = vmatprep.subr.bf16.mxu1 %v3119_v16 }
 0xea6   :  { %v1500_v24 = vpop.permute.xlu1 %1499 }
 0xea7   :  { %2128 = vmatmul.mubr.msk.bf16.vlgmr.msra.gmra.mrb[48].mxu0 %vm262_vm0, %v1500_v24  ;;  %2273 = vmatmul.mubr.msk.bf16.vlgmr.msra.gmra.mrb[40].mxu1 %vm262_vm0, %v1500_v24 }
 0xea8   :  { %1619 = vmatpush1.bf16.msra.mxu0 %v3290_v9  ;;  %1650 = vmatprep.mubr.bf16.mxu0 %v2564_v0 }
 0xea9   :  { %1620 = vmatprep.subr.bf16.mxu0 %v3297_v44  ;;  %1694 = vmatpush1.bf16.msra.mxu1 %v3130_v20 }
 0xeaa   :  { %1695 = vmatprep.subr.bf16.mxu1 %v3136_v21  ;;  %1725 = vmatprep.mubr.bf16.mxu1 %v2564_v0 }
 0xeac   :  { %1621 = vmatpush1.bf16.msra.mxu0 %v3306_v47 }
 0xead   :  { %1622 = vmatprep.subr.bf16.mxu0 %v3312_v26  ;;  %1696 = vmatpush1.bf16.msra.mxu1 %v3145_v22 }
 0xeae   :  { %1697 = vmatprep.subr.bf16.mxu1 %v3151_v52 }
 0xeb0   :  { %1623 = vmatpush1.bf16.msra.mxu0 %v3320_v1 }
 0xeb1   :  { %1624 = vmatprep.subr.bf16.mxu0 %v3326_v63  ;;  %1698 = vmatpush1.bf16.msra.mxu1 %v3159_v54 }
 0xeb2   :  { %1699 = vmatprep.subr.bf16.mxu1 %v3165_v42 }
 0xeb4   :  { %1625 = vmatpush1.bf16.msra.mxu0 %v3334_v2 }
 0xeb5   :  { %2276 = vmatprep.subr.bf16.mxu0 %v2565_v18  ;;  %1700 = vmatpush1.bf16.msra.mxu1 %v3173_v8 }
 0xeb6   :  { %1807 = vmatprep.subr.bf16.mxu1 %v2465_v53 }
 0xf05   :  { %v1463_v4 = vpop.f32.mrb[36].mxu1 }
 0xf06   :  { %v1465_v5 = vpop.f32.mrb[37].mxu1  ;;  %v1464_v30 = vadd.f32 %v1463_v4, %v2965_v32 }
 0xf07   :  { %v1467_v48 = vpop.f32.mrb[38].mxu1  ;;  %v1466_v49 = vadd.f32 %v1465_v5, %v2980_v12 }
 0xf08   :  { %v1468_v50 = vpop.f32.mrb[39].mxu1 }
 0xf09   :  { %v1610_v50 = vld [vmem:[#allocation2 + $0x68] sm:$0xff] }
 0xf7a   :  { %v1538_v7 = vpop.f32.mrb[48].mxu0  ;;  %v1579_v51 = vpop.f32.mrb[40].mxu1 }
 0xf7b   :  { %v1539_v56 = vadd.f32 %v1538_v7, %v2969_v43  ;;  %v1580_v58 = vadd.f32 %v1579_v51, %v2813_v46  ;;  %v1540_v59 = vpop.f32.mrb[49].mxu0  ;;  %v2274_v60 = vpop.f32.mrb[41].mxu1 }
 0xf7c   :  { %v1541_v27 = vadd.f32 %v1540_v59, %v2794_v29  ;;  %v1542_v62 = vpop.f32.mrb[50].mxu0  ;;  %v1582_v57 = vpop.f32.mrb[42].mxu1 }
 0xf7d   :  { %v1585_v11 = vadd.f32 %v1539_v56, %v1464_v30  ;;  %v1543_v15 = vpop.f32.mrb[51].mxu0  ;;  %1663 = vrot.lane.b32.xlu1 %v1580_v58, %s2567_s7  ;;  %v2275_v14 = vpop.f32.mrb[43].mxu1 }
 0xf7e   :  { %1661 = vrot.lane.b32.xlu0 %v1541_v27, %s2567_s7 }
 0xf7f   :  { %v2130_v23 = vmul.f32 -1.442695, %v1585_v11 }
 0xf81   :  { %2412 = vpow2.f32 %v2130_v23 }
 0xf8b   :  { %v2413_v31 = vpop.eup %2412 }
 0xf8c   :  { %v1589_v34 = vadd.f32 1.0, %v2413_v31 }
 0xf8e   :  { %2414 = vrcp.f32 %v1589_v34 }
 0xf98   :  { %v2415_v10 = vpop.eup %2414 }
 0xf99   :  { %v1592_v13 = vmul.f32 %v2415_v10, %v1466_v49  ;;  %v1595_v51 = vsub.f32 1.0, %v2415_v10  ;;  %v1601_v56 = vmul.f32 %v2415_v10, %v3262_v17 }
 0xf9b   :  { %v1593_v61 = vadd.f32 %v1592_v13, %v1541_v27 }
 0xf9d   :  { %2416 = vtanh.f32 %v1593_v61 }
 0xfa7   :  { %v2417_v19 = vpop.eup %2416 }
 0xfa8   :  { %1597 = vrot.lane.b32.xlu0 %v2417_v19, %s2567_s7 }
 0xfef   :  { %v1664_v40 = vpop.permute.xlu1 %1663 }
 0xff0   :  { %v1662_v28 = vpop.permute.xlu0 %1661 }
 0xff1   :  { %v1665_v33 = vsel %vm262_vm0, %v1662_v28, %v1664_v40 }
 0xff2   :  { %v1667_v38 = vadd.f32 %v2466_v41, %v1665_v33 }
 0xff4   :  { %v2132_v24 = vmul.f32 -1.442695, %v1667_v38 }
 0xff6   :  { %2418 = vpow2.f32 %v2132_v24 }
0x1000   :  { %v2419_v53 = vpop.eup %2418 }
0x1001   :  { %v1671_v4 = vadd.f32 1.0, %v2419_v53 }
0x1003   :  { %2420 = vrcp.f32 %v1671_v4 }
0x100d   :  { %v2421_v48 = vpop.eup %2420 }
0x100e   :  { %v1675_v5 = vmul.f32 %v2421_v48, %v1664_v40  ;;  %v1678_v62 = vsub.f32 1.0, %v2421_v48  ;;  %v1684_v11 = vmul.f32 %v2421_v48, %v3269_v25  ;;  %v1798_v40 = vld [vmem:[#allocation2 + $0x70] sm:$0xff]  ;;  %v1799_v48 = vld [vmem:[#allocation2 + $0x78] sm:$0xff] }
0x1010   :  { %v1676_v7 = vadd.f32 %v1675_v5, %v1610_v50 }
0x1012   :  { %2422 = vtanh.f32 %v1676_v7 }
0x101a   :  { %v1598_v30 = vpop.permute.xlu0 %1597 }
0x101b   :  { %v1600_v58 = vmul.f32 %v1598_v30, %v1595_v51 }
0x101c   :  { %v2423_v59 = vpop.eup %2422 }
0x101d   :  { %v3352_v60 = vadd.f32 %v1601_v56, %v1600_v58  ;;  %1680 = vrot.lane.b32.xlu1 %v2423_v59, %s2567_s7 }
0x101f   :  { %v1611_v27 = vpack.c.bf16 %v3352_v60, %v3352_v60 }
0x1021   :  { %1613 = vrot.lane.b32.xlu0 %v1611_v27, %s2567_s7 }
0x108f   :  { %v1681_v57 = vpop.permute.xlu1 %1680 }
0x1090   :  { %v1683_v15 = vmul.f32 %v1681_v57, %v1678_v62 }
0x1092   :  { %v3359_v14 = vadd.f32 %v1684_v11, %v1683_v15 }
0x1093   :  { %v1614_v23 = vpop.permute.xlu0 %1613 }
0x1094   :  { %2131 = vmatmul.mubr.msk.bf16.vlgmr.msra.gmra.mrb[52].mxu0 %vm262_vm0, %v1614_v23  ;;  %v1686_v31 = vpack.c.bf16 %v3359_v14, %v3359_v14 }
0x1095   :  { %2277 = vmatpush3.bf16.msra.mxu0 %v3203_v35  ;;  %2284 = vmatprep.mubr.msk.bf16.mxu0 %vm2566_vm2, %v2565_v18 }
0x1096   :  { %1688 = vrot.lane.b32.xlu1 %v1686_v31, %s2567_s7  ;;  %2278 = vmatprep.subr.bf16.mxu0 %v2565_v18 }
0x1099   :  { %2279 = vmatpush3.bf16.msra.mxu0 %v3213_v6 }
0x109a   :  { %2280 = vmatprep.subr.bf16.mxu0 %v2565_v18 }
0x109d   :  { %2281 = vmatpush3.bf16.msra.mxu0 %v3220_v36 }
0x109e   :  { %2282 = vmatprep.subr.bf16.mxu0 %v2565_v18 }
0x10a1   :  { %2283 = vmatpush3.bf16.msra.mxu0 %v3227_v37 }
0x10a2   :  { %1882 = vmatprep.subr.bf16.mxu0 %v3119_v16 }
0x1108   :  { %v1689_v35 = vpop.permute.xlu1 %1688 }
0x1109   :  { %2133 = vmatmul.mubr.msk.bf16.vlgmr.msra.gmra.mrb[44].mxu1 %vm262_vm0, %v1689_v35  ;;  %2285 = vmatmul.mubr.msk.bf16.vlgmr.msra.gmra.mrb[56].mxu0 %vm262_vm0, %v1689_v35 }
0x110a   :  { %1808 = vmatpush1.bf16.msra.mxu1 %v3290_v9  ;;  %1839 = vmatprep.mubr.bf16.mxu1 %v2564_v0 }
0x110b   :  { %1809 = vmatprep.subr.bf16.mxu1 %v3297_v44  ;;  %1883 = vmatpush1.bf16.msra.mxu0 %v3130_v20 }
0x110c   :  { %1884 = vmatprep.subr.bf16.mxu0 %v3136_v21  ;;  %1914 = vmatprep.mubr.bf16.mxu0 %v2564_v0 }
0x110e   :  { %1810 = vmatpush1.bf16.msra.mxu1 %v3306_v47 }
0x110f   :  { %1811 = vmatprep.subr.bf16.mxu1 %v3312_v26  ;;  %1885 = vmatpush1.bf16.msra.mxu0 %v3145_v22 }
0x1110   :  { %1886 = vmatprep.subr.bf16.mxu0 %v3151_v52 }
0x1112   :  { %1812 = vmatpush1.bf16.msra.mxu1 %v3320_v1 }
0x1113   :  { %1813 = vmatprep.subr.bf16.mxu1 %v3326_v63  ;;  %1887 = vmatpush1.bf16.msra.mxu0 %v3159_v54 }
0x1114   :  { %1888 = vmatprep.subr.bf16.mxu0 %v3165_v42 }
0x1116   :  { %1814 = vmatpush1.bf16.msra.mxu1 %v3334_v2 }
0x1117   :  { %1889 = vmatpush1.bf16.msra.mxu0 %v3173_v8  ;;  %2288 = vmatprep.subr.bf16.mxu1 %v2565_v18 }
0x1167   :  { %v1652_v0 = vpop.f32.mrb[52].mxu0 }
0x1168   :  { %v1654_v16 = vpop.f32.mrb[53].mxu0  ;;  %v1653_v6 = vadd.f32 %v1652_v0, %v2965_v32 }
0x1169   :  { %v1656_v20 = vpop.f32.mrb[54].mxu0 }
0x116a   :  { %v1657_v21 = vpop.f32.mrb[55].mxu0 }
0x11dc   :  { %v1727_v22 = vpop.f32.mrb[44].mxu1  ;;  %v1768_v52 = vpop.f32.mrb[56].mxu0 }
0x11dd   :  { %v1728_v36 = vadd.f32 %v1727_v22, %v2969_v43  ;;  %v1769_v54 = vadd.f32 %v1768_v52, %v2813_v46  ;;  %v1729_v37 = vpop.f32.mrb[45].mxu1  ;;  %v2286_v42 = vpop.f32.mrb[57].mxu0  ;;  %v1655_v46 = vadd.f32 %v1654_v16, %v2980_v12 }
0x11de   :  { %v1730_v25 = vadd.f32 %v1729_v37, %v2794_v29  ;;  %v1731_v9 = vpop.f32.mrb[46].mxu1  ;;  %v1771_v8 = vpop.f32.mrb[58].mxu0 }
0x11df   :  { %v1774_v44 = vadd.f32 %v1728_v36, %v1653_v6  ;;  %v1732_v47 = vpop.f32.mrb[47].mxu1  ;;  %1852 = vrot.lane.b32.xlu1 %v1769_v54, %s2567_s7  ;;  %v2287_v26 = vpop.f32.mrb[59].mxu0 }
0x11e0   :  { %1850 = vrot.lane.b32.xlu0 %v1730_v25, %s2567_s7 }
0x11e1   :  { %v2135_v1 = vmul.f32 -1.442695, %v1774_v44 }
0x11e3   :  { %2424 = vpow2.f32 %v2135_v1 }
0x11ed   :  { %v2425_v63 = vpop.eup %2424 }
0x11ee   :  { %v1778_v2 = vadd.f32 1.0, %v2425_v63 }
0x11f0   :  { %2426 = vrcp.f32 %v1778_v2  ;;  %v2343_v2 = vld [vmem:[%s3498_s8 + $0x8] sm:$0xff]  }
0x11fa   :  { %v2427_v34 = vpop.eup %2426 }
0x11fb   :  { %v1781_v49 = vmul.f32 %v2427_v34, %v1655_v46  ;;  %v1784_v50 = vsub.f32 1.0, %v2427_v34  ;;  %v1790_v51 = vmul.f32 %v2427_v34, %v3352_v60 }
0x11fd   :  { %v1782_v10 = vadd.f32 %v1781_v49, %v1730_v25 }
0x11ff   :  { %2428 = vtanh.f32 %v1782_v10 }
0x1209   :  { %v2429_v13 = vpop.eup %2428 }
0x120a   :  { %1786 = vrot.lane.b32.xlu0 %v2429_v13, %s2567_s7 }
0x1251   :  { %v1853_v61 = vpop.permute.xlu1 %1852 }
0x1252   :  { %v1851_v19 = vpop.permute.xlu0 %1850 }
0x1253   :  { %v1854_v28 = vsel %vm262_vm0, %v1851_v19, %v1853_v61 }
0x1254   :  { %v1856_v33 = vadd.f32 %v1854_v28, %v1798_v40  ;;  %v2140_v40 = vld [vmem:[#allocation9] ss:$0 sm:$0xff] }
0x1256   :  { %v2137_v41 = vmul.f32 -1.442695, %v1856_v33 }
0x1258   :  { %2430 = vpow2.f32 %v2137_v41 }
0x1262   :  { %v2431_v38 = vpop.eup %2430 }
0x1263   :  { %v1860_v24 = vadd.f32 1.0, %v2431_v38 }
0x1265   :  { %2432 = vrcp.f32 %v1860_v24 }
0x126f   :  { %v2433_v53 = vpop.eup %2432 }
0x1270   :  { %v1864_v4 = vmul.f32 %v2433_v53, %v1853_v61  ;;  %v1867_v27 = vsub.f32 1.0, %v2433_v53  ;;  %v1873_v57 = vmul.f32 %v2433_v53, %v3359_v14 }
0x1272   :  { %v1865_v5 = vadd.f32 %v1864_v4, %v1799_v48 }
0x1274   :  { %2434 = vtanh.f32 %v1865_v5 }
0x127c   :  { %v1787_v7 = vpop.permute.xlu0 %1786 }
0x127d   :  { %v1789_v30 = vmul.f32 %v1787_v7, %v1784_v50 }
0x127e   :  { %v2435_v56 = vpop.eup %2434 }
0x127f   :  { %v3404_v58 = vadd.f32 %v1790_v51, %v1789_v30  ;;  %1869 = vrot.lane.b32.xlu1 %v2435_v56, %s2567_s7 }
0x1281   :  { %v1800_v59 = vpack.c.bf16 %v3404_v58, %v3404_v58 }
0x1283   :  { %1802 = vrot.lane.b32.xlu0 %v1800_v59, %s2567_s7 }
0x12f1   :  { %v1870_v62 = vpop.permute.xlu1 %1869 }
0x12f2   :  { %v1872_v11 = vmul.f32 %v1870_v62, %v1867_v27 }
0x12f4   :  { %v3411_v15 = vadd.f32 %v1873_v57, %v1872_v11 }
0x12f5   :  { %v1803_v23 = vpop.permute.xlu0 %1802 }
0x12f6   :  { %2136 = vmatmul.mubr.msk.bf16.vlgmr.msra.gmra.mrb[48].mxu1 %vm262_vm0, %v1803_v23  ;;  %v1875_v31 = vpack.c.bf16 %v3411_v15, %v3411_v15 }
0x12f7   :  { %2296 = vmatprep.mubr.msk.bf16.mxu1 %vm2566_vm2, %v2565_v18 }
0x12f8   :  { %1877 = vrot.lane.b32.xlu1 %v1875_v31, %s2567_s7 }
0x12fc   :  { %658 = vrot.lane.b32.xlu1 %v2986_v55, %s2567_s7 }
0x1300   :  { %1037 = vrot.lane.b32.xlu1 %v3094_v3, %s2567_s7 }
0x1304   :  { %1415 = vrot.lane.b32.xlu1 %v3262_v17, %s2567_s7 }
0x1308   :  { %1793 = vrot.lane.b32.xlu1 %v3404_v58, %s2567_s7 }
0x136a   :  { %v1878_v14 = vpop.permute.xlu1 %1877 }
0x136b   :  { %2138 = vmatmul.mubr.msk.bf16.vlgmr.msra.gmra.mrb[60].mxu0 %vm262_vm0, %v1878_v14 }
0x136e   :  { %v659_v35 = vpop.permute.xlu1 %658 }
0x136f   :  { %662 = vst.msk [vmem:[#allocation3 - $0x3] sm:$0x8] %vm661_vm3, %v659_v35 }
0x1372   :  { %v1038_v0 = vpop.permute.xlu1 %1037 }
0x1373   :  { %1040 = vst.msk [vmem:[#allocation3 - $0x1] sm:$0x8] %vm661_vm3, %v1038_v0 }
0x1376   :  { %v1416_v55 = vpop.permute.xlu1 %1415 }
0x1377   :  { %1418 = vst.msk [vmem:[#allocation3 + $0x1] sm:$0x8] %vm661_vm3, %v1416_v55 }
0x137a   :  { %v1794_v3 = vpop.permute.xlu1 %1793 }
0x137b   :  { %1796 = vst.msk [vmem:[#allocation3 + $0x3] sm:$0x8] %vm661_vm3, %v1794_v3 }
0x13c9   :  { %v1841_v17 = vpop.f32.mrb[48].mxu1 }
0x13ca   :  { %v1843_v16 = vpop.f32.mrb[49].mxu1  ;;  %v1842_v52 = vadd.f32 %v1841_v17, %v2965_v32 }
0x13cb   :  { %v1845_v20 = vpop.f32.mrb[50].mxu1  ;;  %v1844_v44 = vadd.f32 %v1843_v16, %v2980_v12  ;;  %v2345_v12 = vld [vmem:[%s3498_s8 + $0x18] sm:$0xff]  }
0x13cc   :  { %v1846_v21 = vpop.f32.mrb[51].mxu1 }
0x143e   :  { %v1916_v22 = vpop.f32.mrb[60].mxu0 }
0x143f   :  { %v1917_v6 = vadd.f32 %v1916_v22, %v2969_v43  ;;  %v1918_v36 = vpop.f32.mrb[61].mxu0  ;;  %v2342_v43 = vld [vmem:[%s3498_s8] sm:$0xff]  }
0x1440   :  { %v1920_v54 = vpop.f32.mrb[62].mxu0  ;;  %v1919_v26 = vadd.f32 %v1918_v36, %v2794_v29  ;;  %2289 = vmatpush3.bf16.msra.mxu1 %v2342_v43  ;;  %v2344_v29 = vld [vmem:[%s3498_s8 + $0x10] sm:$0xff]  }
0x1441   :  { %v1923_v37 = vadd.f32 %v1917_v6, %v1842_v52  ;;  %v1921_v42 = vpop.f32.mrb[63].mxu0  ;;  %2290 = vmatprep.subr.bf16.mxu1 %v2565_v18 }
0x1443   :  { %v2139_v25 = vmul.f32 -1.442695, %v1923_v37 }
0x1444   :  { %2291 = vmatpush3.bf16.msra.mxu1 %v2343_v2 }
0x1445   :  { %2436 = vpow2.f32 %v2139_v25  ;;  %2292 = vmatprep.subr.bf16.mxu1 %v2565_v18 }
0x1448   :  { %2293 = vmatpush3.bf16.msra.mxu1 %v2344_v29 }
0x1449   :  { %2294 = vmatprep.subr.bf16.mxu1 %v2565_v18 }
0x144c   :  { %2295 = vmatpush3.bf16.msra.mxu1 %v2345_v12 }
0x144f   :  { %v2437_v9 = vpop.eup %2436 }
0x1450   :  { %v1927_v8 = vadd.f32 1.0, %v2437_v9 }
0x1452   :  { %2438 = vrcp.f32 %v1927_v8 }
0x145c   :  { %v2439_v47 = vpop.eup %2438 }
0x145d   :  { %v1930_v1 = vmul.f32 %v2439_v47, %v1844_v44  ;;  %v1939_v34 = vmul.f32 %v2439_v47, %v3404_v58 }
0x145f   :  { %v1931_v63 = vadd.f32 %v1930_v1, %v1919_v26 }
0x1461   :  { %2440 = vtanh.f32 %v1931_v63 }
0x146b   :  { %v2441_v32 = vpop.eup %2440 }
0x146c   :  { %1935 = vrot.lane.b32.xlu0 %v2441_v32, %s2567_s7 }
0x1470   :  { %848 = vrot.lane.b32.xlu0 %v3040_v39, %s2567_s7  ;;  %v1933_v39 = vsub.f32 1.0, %v2439_v47 }
0x1474   :  { %1226 = vrot.lane.b32.xlu0 %v3188_v45, %s2567_s7 }
0x1478   :  { %1604 = vrot.lane.b32.xlu0 %v3352_v60, %s2567_s7 }
0x14de   :  { %v1936_v46 = vpop.permute.xlu0 %1935 }
0x14df   :  { %v1938_v45 = vmul.f32 %v1936_v46, %v1933_v39 }
0x14e1   :  { %v1940_v49 = vadd.f32 %v1939_v34, %v1938_v45 }
0x14e2   :  { %v849_v10 = vpop.permute.xlu0 %848 }
0x14e3   :  { %851 = vst.msk [vmem:[#allocation3 - $0x2] sm:$0x8] %vm661_vm3, %v849_v10  ;;  %1942 = vrot.lane.b32.xlu0 %v1940_v49, %s2567_s7 }
0x14e6   :  { %v1227_v60 = vpop.permute.xlu0 %1226 }
0x14e7   :  { %1229 = vst.msk [vmem:[#allocation3] sm:$0x8] %vm661_vm3, %v1227_v60 }
0x14ea   :  { %v1605_v13 = vpop.permute.xlu0 %1604 }
0x14eb   :  { %1607 = vst.msk [vmem:[#allocation3 + $0x2] sm:$0x8] %vm661_vm3, %v1605_v13 }
0x1555   :  { %v1943_v61 = vpop.permute.xlu0 %1942 }
0x1556   :  { %1945 = vst.msk [vmem:[#allocation3 + $0x4] sm:$0x8] %vm661_vm3, %v1943_v61 }
0x1557   :  { %2146 = vst.msk [vmem:[%s3501_s11 + $0x8] sm:$0xff] %vm262_vm0, %v1943_v61 }
0x155d   :  { %v1946_v18 = vld [vmem:[#allocation3] sm:$0xff] }
0x155e   :  { %v1947_v19 = vpack.c.bf16 %v1946_v18, %v1946_v18 }
0x1560   :  { %2297 = vmatmul.mubr.msk.bf16.vlgmr.msra.gmra.mrb[52].mxu1 %vm262_vm0, %v1947_v19 }
0x1633   :  { %v2024_v28 = vpop.f32.mrb[52].mxu1 }
0x1634   :  { %v2025_v33 = vadd.f32 %v2140_v40, %v2024_v28  ;;  %v2298_v41 = vpop.f32.mrb[53].mxu1 }
0x1635   :  { %v2027_v38 = vpop.f32.mrb[54].mxu1 }
0x1636   :  { %v2299_v24 = vpop.f32.mrb[55].mxu1  ;;  %v2031_v53 = vsel %vm2030_vm4, %v2025_v33, -inf }
0x1637   :  { %2032 = vmax.xlane.f32.xlu1 %v2031_v53 }
0x16c4   :  { %v2033_v4 = vpop.xlane.xlu1 %2032 }
0x16c5   :  { %v2034_v48 = vsub.f32 %v2025_v33, %v2033_v4 }
0x16c7   :  { %v2035_v5 = vmul.f32 1.442695, %v2034_v48 }
0x16c9   :  { %2442 = vpow2.f32 %v2035_v5 }
0x16d3   :  { %v2443_v50 = vpop.eup %2442 }
0x16d4   :  { %v2037_v7 = vsel %vm2030_vm4, %v2443_v50, 0.0 }
0x16d5   :  { %2038 = vadd.xlane.f32.xlu0 %v2037_v7 }
0x16eb   :  { %2044 = vrot.lane.b32.xlu0 %v3411_v15, %s2567_s7 }
0x1762   :  { %v2039_v51 = vpop.xlane.xlu0 %2038 }
0x1763   :  { %2444 = vrcp.f32 %v2039_v51 }
0x1766   :  { %v2045_v30 = vpop.permute.xlu0 %2044 }
0x1767   :  { %2047 = vst.msk [vmem:[%s3501_s11] sm:$0xff] %vm262_vm0, %v2045_v30 }
0x176d   :  { %v2445_v56 = vpop.eup %2444 }
0x176e   :  { %v2041_v58 = vmul.f32 %v2445_v56, %v2443_v50 }
0x1770   :  { %2042 = vst.msk [vmem:[#allocation10] sm:$0xff] %vm2030_vm4, %v2041_v58 }
0x1771   :  { %2544 = shalt.err (!%p2541_p0)
}
0x1772   :  { %s2545_s16 = scalar_lea.hbm %s3500_s10, 128 }
0x1773   :  { %p2546_p1 = scmp.ne.s32.totalorder %s3500_s10, %s2545_s16  ;;  %p2549_p2 = scmp.lt.u32.totalorder %s2545_s16, %s3500_s10 }
0x1775   :  { %p2551_p3 = pnand %p2549_p2, %p2546_p1 }
0x1777   :  { %2554 = shalt.err (!%p2551_p3)
}
0x1778   :  { %2059 = dma.vmem_to_hbm [thread:$0]  %s2057_s15, 128, %s3500_s10, [#allocation6]  }
0x1779   :  { %2559 = dma.done.wait [#allocation6], 128  }
0x177a   :  { %2560 = vsyncadd [#allocation6], 4294967168 }
0x177b   :  { %2067 = vsyncpa [#allocation5], 1 }
0x177c   :  { %2068 = vsyncpa [#allocation8], 1 }
0x177d   :  { %2069 = vsyncpa [#allocation6], 1 }

</bundles_post_ra>
